<compile_context>
chip_gen: v5e
topology: v5e:2x2
jax: 0.10.0
libtpu: 0.0.40
codegen_flags: <defaults>
</compile_context>

<pallas_src>
import functools
import math

import jax
import jax.numpy as jnp
from jax.experimental import pallas as pl
from jax.experimental.pallas import tpu as pltpu

_VMEM_LIMIT = 40 * 1024 * 1024   # scoped VMEM budget; safe on v5e/v6e/v7x


def _layer_norm(x, gamma, beta, eps):
    mu = jnp.mean(x, axis=-1, keepdims=True)
    xc = x - mu
    var = jnp.mean(xc * xc, axis=-1, keepdims=True)
    return xc * jax.lax.rsqrt(var + eps) * gamma + beta


# ----------------------------------------------------------------------------
# Kernel 1: K/V projection, emitted head-major (nhead, N_pad, dh).
# Q is computed inside the attention kernel (x is resident there anyway).
# ----------------------------------------------------------------------------
def _kv_proj_kernel(x_ref, wk_ref, bk_ref, wv_ref, bv_ref, k_ref, v_ref):
    f32 = jnp.float32
    x = x_ref[...].astype(wk_ref.dtype)            # bf16 MXU inputs
    for h in range(k_ref.shape[0]):                # leading-axis (head) slices only
        k_ref[h] = (jnp.dot(x, wk_ref[h], preferred_element_type=f32)
                    + bk_ref[h]).astype(k_ref.dtype)
        v_ref[h] = (jnp.dot(x, wv_ref[h], preferred_element_type=f32)
                    + bv_ref[h]).astype(v_ref.dtype)


# ----------------------------------------------------------------------------
# Kernel 2: flash attention over the block-diagonal (per-crystal) mask with a
# data-dependent clamped k-tile range, head-major online-softmax state, and a
# fused out-proj + residual + LN1 + FFN + residual + LN2 epilogue.
# ----------------------------------------------------------------------------
def _flash_layer_kernel(kstart_sm, knum_sm,
                        k_ref, v_ref, x_ref, bidq_ref, bidk_ref,
                        wq_ref, bq_ref, wo_ref, bo_ref,
                        g1_ref, be1_ref, w1_ref, b1_ref,
                        w2_ref, b2_ref, g2_ref, be2_ref,
                        o_ref,
                        q_scr, m_ref, l_ref, acc_ref,
                        *, nhead, eps):
    del kstart_sm                                  # used only by the index maps
    qi = pl.program_id(0)
    ki = pl.program_id(1)
    nk = pl.num_programs(1)
    dh = k_ref.shape[-1]
    scale = 1.0 / math.sqrt(dh)
    f32 = jnp.float32

    @pl.when(ki == 0)
    def _init():
        m_ref[...] = jnp.full_like(m_ref, -1e30)
        l_ref[...] = jnp.zeros_like(l_ref)
        acc_ref[...] = jnp.zeros_like(acc_ref)
        # Q for this q-tile (once per qi), head-major into VMEM scratch.
        x = x_ref[...].astype(wq_ref.dtype)
        for h in range(nhead):
            q_scr[h] = (jnp.dot(x, wq_ref[h], preferred_element_type=f32)
                        + bq_ref[h]).astype(q_scr.dtype)

    # Only k-tiles whose batch-id range overlaps this q-tile are streamed; the
    # index_map clamps past-the-end steps to the last valid tile (DMA deduped)
    # and the compute is skipped here.
    @pl.when(ki < knum_sm[qi])
    def _tile():
        q = q_scr[...]                             # (nhead, blk, dh) bf16
        k = k_ref[...]
        v = v_ref[...]
        mask = bidq_ref[...] == bidk_ref[...]      # (blk, blk) — shared by heads
        bias = jnp.where(mask, 0.0, -1e30)[None]   # additive mask, hoisted
        maskf = mask.astype(f32)[None]
        s = jnp.einsum('hqd,hkd->hqk', q, k,
                       preferred_element_type=f32) * scale + bias
        m_prev = m_ref[...]                        # (nhead, blk, 1)
        m_new = jnp.maximum(m_prev, jnp.max(s, axis=-1, keepdims=True))
        alpha = jnp.exp(m_prev - m_new)
        # maskf kills the exp(0)=1 leakage for rows fully masked in this tile.
        p = jnp.exp(s - m_new) * maskf
        l_ref[...] = alpha * l_ref[...] + jnp.sum(p, axis=-1, keepdims=True)
        acc_ref[...] = alpha * acc_ref[...] + jnp.einsum(
            'hqk,hkd->hqd', p.astype(v.dtype), v, preferred_element_type=f32)
        m_ref[...] = m_new

    @pl.when(ki == nk - 1)
    def _finalize():
        blk, D = x_ref.shape
        inv_l = pl.reciprocal(l_ref[...], approx=True)      # EUP, (nhead, blk, 1)
        ctx = (acc_ref[...] * inv_l).astype(wo_ref.dtype)    # (nhead, blk, dh)
        # out-projection: sum over heads of (blk, dh) @ (dh, D)
        sa = jnp.zeros((blk, D), f32)
        for h in range(nhead):
            sa = sa + jnp.dot(ctx[h], wo_ref[h], preferred_element_type=f32)
        sa = sa + bo_ref[...]
        # residual + LN1
        y = x_ref[...].astype(f32) + sa
        y = _layer_norm(y, g1_ref[...], be1_ref[...], eps)
        # feed-forward: linear2(relu(linear1(y)))   (relu = module default)
        h1 = jnp.dot(y.astype(w1_ref.dtype), w1_ref[...],
                     preferred_element_type=f32) + b1_ref[...]
        h1 = jnp.maximum(h1, 0.0)
        ff = jnp.dot(h1.astype(w2_ref.dtype), w2_ref[...],
                     preferred_element_type=f32) + b2_ref[...]
        # residual + LN2
        o_ref[...] = _layer_norm(y + ff, g2_ref[...], be2_ref[...],
                                 eps).astype(o_ref.dtype)


# ----------------------------------------------------------------------------
# Wrapper
# ----------------------------------------------------------------------------
def crystalformer_encoder_layer(src, batch, params, *, nhead,
                                layer_norm_eps=1e-5, block_rows=128):
    """src: (N, d_model) f32; batch: (N,) int, non-decreasing (crystal-packed).

    Must be called with a concrete `batch` (outside jit): the per-q-tile
    k-tile-overlap count sets the static second grid extent.
    block_rows: 128 fills v5e's 128-wide MXU; prefer 256 on v6e/v7x.
    """
    N, D = src.shape
    assert D % nhead == 0, "d_model must be divisible by nhead"
    dh = D // nhead
    blk = block_rows
    assert blk % 8 == 0
    n_tiles = (N + blk - 1) // blk
    N_pad = n_tiles * blk
    pad = N_pad - N

    batch_i32 = jnp.asarray(batch, jnp.int32)
    if pad:
        src_p = jnp.pad(src, ((0, pad), (0, 0)))
        # unique ids > all real ids: each padded row attends only to itself.
        pad_ids = jnp.max(batch_i32) + 1 + jnp.arange(pad, dtype=jnp.int32)
        batch_p = jnp.concatenate([batch_i32, pad_ids])
    else:
        src_p, batch_p = src, batch_i32

    # ---- per-tile overlap table driving the data-dependent K/V streaming ----
    tile_ids = batch_p.reshape(n_tiles, blk)
    tile_lo, tile_hi = tile_ids[:, 0], tile_ids[:, -1]
    kstart = jnp.searchsorted(tile_hi, tile_lo, side='left').astype(jnp.int32)
    kend = (jnp.searchsorted(tile_lo, tile_hi, side='right') - 1).astype(jnp.int32)
    knum = (kend - kstart + 1).astype(jnp.int32)
    max_k = int(jnp.max(knum))               # static second grid extent <= n_tiles

    bidq = batch_p.reshape(N_pad, 1)
    bidk = batch_p.reshape(1, N_pad)

    bf16 = jnp.bfloat16
    # head-major weight layouts
    wq_h = params['wq'].reshape(D, nhead, dh).transpose(1, 0, 2).astype(bf16)
    wk_h = params['wk'].reshape(D, nhead, dh).transpose(1, 0, 2).astype(bf16)
    wv_h = params['wv'].reshape(D, nhead, dh).transpose(1, 0, 2).astype(bf16)
    bq_h = params['bq'].reshape(nhead, 1, dh)
    bk_h = params['bk'].reshape(nhead, 1, dh)
    bv_h = params['bv'].reshape(nhead, 1, dh)
    wo_h = params['wo'].reshape(nhead, dh, D).astype(bf16)
    w1 = params['w1'].astype(bf16)
    w2 = params['w2'].astype(bf16)
    dff = w1.shape[1]

    # ---- kernel 1: head-major K/V projection --------------------------------
    k_hm, v_hm = pl.pallas_call(
        _kv_proj_kernel,
        grid=(n_tiles,),
        in_specs=[pl.BlockSpec((blk, D), lambda i: (i, 0)),
                  pl.BlockSpec((nhead, D, dh), lambda i: (0, 0, 0)),
                  pl.BlockSpec((nhead, 1, dh), lambda i: (0, 0, 0)),
                  pl.BlockSpec((nhead, D, dh), lambda i: (0, 0, 0)),
                  pl.BlockSpec((nhead, 1, dh), lambda i: (0, 0, 0))],
        out_specs=[pl.BlockSpec((nhead, blk, dh), lambda i: (0, i, 0))] * 2,
        out_shape=[jax.ShapeDtypeStruct((nhead, N_pad, dh), bf16)] * 2,
        compiler_params=pltpu.CompilerParams(
            dimension_semantics=("parallel",),
            vmem_limit_bytes=_VMEM_LIMIT),
    )(src_p, wk_h, bk_h, wv_h, bv_h)

    # ---- kernel 2: flash attention + out-proj + LN1 + FFN + LN2 -------------
    def q_map(qi, ki, ks, kn):                      # row tile of x / bidq / out
        return (qi, 0)

    def kv_map(qi, ki, ks, kn):                     # clamped, data-dependent
        return (0, ks[qi] + jnp.minimum(ki, kn[qi] - 1), 0)

    def bidk_map(qi, ki, ks, kn):
        return (0, ks[qi] + jnp.minimum(ki, kn[qi] - 1))

    def const2(qi, ki, ks, kn):
        return (0, 0)

    def const3(qi, ki, ks, kn):
        return (0, 0, 0)

    out_p = pl.pallas_call(
        functools.partial(_flash_layer_kernel, nhead=nhead, eps=layer_norm_eps),
        grid_spec=pltpu.PrefetchScalarGridSpec(
            num_scalar_prefetch=2,                  # kstart, knum -> SMEM
            grid=(n_tiles, max_k),
            in_specs=[
                pl.BlockSpec((nhead, blk, dh), kv_map),    # K (head-major)
                pl.BlockSpec((nhead, blk, dh), kv_map),    # V (head-major)
                pl.BlockSpec((blk, D), q_map),             # x (residual / Q src)
                pl.BlockSpec((blk, 1), q_map),             # batch ids, q rows
                pl.BlockSpec((1, blk), bidk_map),          # batch ids, k rows
                pl.BlockSpec((nhead, D, dh), const3),      # Wq (head-major)
                pl.BlockSpec((nhead, 1, dh), const3),      # bq
                pl.BlockSpec((nhead, dh, D), const3),      # Wo (head-major)
                pl.BlockSpec((1, D), const2),              # bo
                pl.BlockSpec((1, D), const2),              # g1
                pl.BlockSpec((1, D), const2),              # be1
                pl.BlockSpec((D, dff), const2),            # w1
                pl.BlockSpec((1, dff), const2),            # b1
                pl.BlockSpec((dff, D), const2),            # w2
                pl.BlockSpec((1, D), const2),              # b2
                pl.BlockSpec((1, D), const2),              # g2
                pl.BlockSpec((1, D), const2),              # be2
            ],
            out_specs=pl.BlockSpec((blk, D), q_map),
            scratch_shapes=[
                pltpu.VMEM((nhead, blk, dh), bf16),          # Q (per q tile)
                pltpu.VMEM((nhead, blk, 1), jnp.float32),    # running max m
                pltpu.VMEM((nhead, blk, 1), jnp.float32),    # running sum l
                pltpu.VMEM((nhead, blk, dh), jnp.float32),   # fp32 accumulator
            ]),
        out_shape=jax.ShapeDtypeStruct((N_pad, D), src.dtype),
        compiler_params=pltpu.CompilerParams(
            dimension_semantics=("parallel", "arbitrary"),
            vmem_limit_bytes=_VMEM_LIMIT),
    )(kstart, knum, k_hm, v_hm, src_p, bidq, bidk,
      wq_h, bq_h, wo_h, params['bo'], params['g1'], params['be1'],
      w1, params['b1'], w2, params['b2'], params['g2'], params['be2'])

    return out_p[:N]


# ----------------------------------------------------------------------------
# Deterministic parameter construction (synthetic, xavier-uniform style)
# ----------------------------------------------------------------------------
def make_params(key, d_model, dim_feedforward):
    def xavier(k, shape):
        a = math.sqrt(6.0 / (shape[0] + shape[1]))
        return jax.random.uniform(k, shape, jnp.float32, -a, a)

    D = d_model
    ks = jax.random.split(key, 12)
    f32 = jnp.float32
    return {
        'wq': xavier(ks[0], (D, D)),
        'bq': 0.02 * jax.random.normal(ks[6], (1, D), f32),
        'wk': xavier(ks[1], (D, D)),
        'bk': 0.02 * jax.random.normal(ks[7], (1, D), f32),
        'wv': xavier(ks[2], (D, D)),
        'bv': 0.02 * jax.random.normal(ks[8], (1, D), f32),
        'wo': xavier(ks[3], (D, D)),
        'bo': 0.02 * jax.random.normal(ks[9], (1, D), f32),
        'w1': xavier(ks[4], (D, dim_feedforward)),
        'b1': jnp.zeros((1, dim_feedforward), f32),
        'w2': xavier(ks[5], (dim_feedforward, D)),
        'b2': jnp.zeros((1, D), f32),
        'g1': 1.0 + 0.1 * jax.random.normal(ks[10], (1, D), f32),
        'be1': 0.1 * jax.random.normal(ks[11], (1, D), f32),
        'g2': jnp.ones((1, D), f32),
        'be2': jnp.zeros((1, D), f32),
    }


# ----------------------------------------------------------------------------
# Pure-JAX reference (same math; matmul_dtype controls MXU input precision)
# ----------------------------------------------------------------------------
def _reference(src, batch, p, nhead, eps=1e-5, matmul_dtype=jnp.float32):
    N, D = src.shape
    dh = D // nhead
    f32 = jnp.float32

    def mm(a, b):
        return jnp.dot(a.astype(matmul_dtype), b.astype(matmul_dtype),
                       preferred_element_type=f32)

    q = mm(src, p['wq']) + p['bq']
    k = mm(src, p['wk']) + p['bk']
    v = mm(src, p['wv']) + p['bv']
    mask = batch[:, None] == batch[None, :]
    cols = []
    for h in range(nhead):
        cs = slice(h * dh, (h + 1) * dh)
        s = jnp.dot(q[:, cs].astype(matmul_dtype),
                    k[:, cs].astype(matmul_dtype).T,
                    preferred_element_type=f32) / math.sqrt(dh)
        s = jnp.where(mask, s, -1e30)
        m = jnp.max(s, axis=-1, keepdims=True)
        e = jnp.where(mask, jnp.exp(s - m), 0.0)
        l = jnp.sum(e, axis=-1, keepdims=True)
        cols.append(jnp.dot(e.astype(matmul_dtype),
                            v[:, cs].astype(matmul_dtype),
                            preferred_element_type=f32) / l)
    ctx = jnp.concatenate(cols, axis=-1)
    sa = mm(ctx, p['wo']) + p['bo']

    def ln(x, g, b):
        mu = x.mean(-1, keepdims=True)
        var = ((x - mu) ** 2).mean(-1, keepdims=True)
        return (x - mu) * jax.lax.rsqrt(var + eps) * g + b

    y = ln(src + sa, p['g1'], p['be1'])
    ff = mm(jnp.maximum(mm(y, p['w1']) + p['b1'], 0.0), p['w2']) + p['b2']
    return ln(y + ff, p['g2'], p['be2'])


if __name__ == "__main__":
    d_model, nhead, dim_feedforward = 32, 4, 64
    n0, n1 = 180, 120                 # two crystals, packed contiguously
    N = n0 + n1                       # spans multiple 128-row tiles

    key = jax.random.PRNGKey(0)
    kx, kp = jax.random.split(key)
    src = jax.random.normal(kx, (N, d_model), jnp.float32)
    batch = jnp.concatenate([jnp.zeros((n0,), jnp.int32),
                             jnp.ones((n1,), jnp.int32)])
    assert bool(jnp.all(batch[1:] >= batch[:-1])), "batch must be packed/sorted"
    params = make_params(kp, d_model, dim_feedforward)

    out = crystalformer_encoder_layer(src, batch, params, nhead=nhead)
    out = jax.block_until_ready(out)

    assert out.shape == (N, d_model)
    assert bool(jnp.all(jnp.isfinite(out)))
    # matched-precision reference (bf16 MXU inputs, fp32 accumulation)
    ref_bf16 = _reference(src, batch, params, nhead, matmul_dtype=jnp.bfloat16)
    # full-fp32 reference (module semantics); looser tol because the kernel
    # intentionally feeds the MXU in bf16
    ref_f32 = _reference(src, batch, params, nhead, matmul_dtype=jnp.float32)
    err_b = float(jnp.max(jnp.abs(out - ref_bf16)))
    err_f = float(jnp.max(jnp.abs(out - ref_f32)))
    assert err_b < 5e-2, f"mismatch vs bf16-matched ref: {err_b}"
    assert err_f < 2e-1, f"mismatch vs fp32 ref: {err_f}"
    print("KERNEL_OK")
</pallas_src>

<mosaic_0001>
module attributes {stable_mosaic.version = 11 : i64} {
  func.func @_kv_proj_kernel(%arg0: i32, %arg1: memref<128x32xf32, #tpu.memory_space<vmem>>, %arg2: memref<4x32x8xbf16, #tpu.memory_space<vmem>>, %arg3: memref<4x1x8xf32, #tpu.memory_space<vmem>>, %arg4: memref<4x32x8xbf16, #tpu.memory_space<vmem>>, %arg5: memref<4x1x8xf32, #tpu.memory_space<vmem>>, %arg6: memref<4x128x8xbf16, #tpu.memory_space<vmem>>, %arg7: memref<4x128x8xbf16, #tpu.memory_space<vmem>>) attributes {dimension_semantics = [#tpu.dimension_semantics<parallel>], iteration_bounds = array<i64: 3>, scalar_prefetch = 0 : i64, scratch_operands = 0 : i64, tpu.core_type = #tpu.core_type<tc>, window_params = [{transform_indices = @transform_0, window_bounds = array<i64: 128, 32>}, {pipeline_mode = #tpu.pipeline_mode<synchronous>, transform_indices = @transform_1, window_bounds = array<i64: 4, 32, 8>}, {pipeline_mode = #tpu.pipeline_mode<synchronous>, transform_indices = @transform_2, window_bounds = array<i64: 4, 1, 8>}, {pipeline_mode = #tpu.pipeline_mode<synchronous>, transform_indices = @transform_3, window_bounds = array<i64: 4, 32, 8>}, {pipeline_mode = #tpu.pipeline_mode<synchronous>, transform_indices = @transform_4, window_bounds = array<i64: 4, 1, 8>}, {transform_indices = @transform_5, window_bounds = array<i64: 4, 128, 8>}, {transform_indices = @transform_6, window_bounds = array<i64: 4, 128, 8>}]} {
    %c0 = arith.constant 0 : index
    %c0_0 = arith.constant 0 : index
    %0 = vector.load %arg1[%c0, %c0_0] : memref<128x32xf32, #tpu.memory_space<vmem>>, vector<128x32xf32>
    %1 = arith.truncf %0 : vector<128x32xf32> to vector<128x32xbf16>
    %c0_1 = arith.constant 0 : index
    %c0_2 = arith.constant 0 : index
    %c0_3 = arith.constant 0 : index
    %2 = vector.load %arg2[%c0_1, %c0_2, %c0_3] : memref<4x32x8xbf16, #tpu.memory_space<vmem>>, vector<1x32x8xbf16>
    %3 = vector.shape_cast %2 : vector<1x32x8xbf16> to vector<32x8xbf16>
    %cst = arith.constant dense<0.000000e+00> : vector<128x8xf32>
    %4 = tpu.matmul %1, %3, %cst {dimension_numbers = #tpu.dot_dimension_numbers<[1], [0], [0], [1], [0, 0, 1, 1], [], []>} : vector<128x32xbf16>, vector<32x8xbf16>, vector<128x8xf32> -> vector<128x8xf32>
    %c0_4 = arith.constant 0 : index
    %c0_5 = arith.constant 0 : index
    %c0_6 = arith.constant 0 : index
    %5 = vector.load %arg3[%c0_4, %c0_5, %c0_6] : memref<4x1x8xf32, #tpu.memory_space<vmem>>, vector<1x1x8xf32>
    %6 = vector.shape_cast %5 : vector<1x1x8xf32> to vector<1x8xf32>
    %7 = vector.broadcast %6 : vector<1x8xf32> to vector<128x8xf32>
    %8 = arith.addf %4, %7 : vector<128x8xf32>
    %9 = arith.truncf %8 : vector<128x8xf32> to vector<128x8xbf16>
    %c0_7 = arith.constant 0 : index
    %c0_8 = arith.constant 0 : index
    %c0_9 = arith.constant 0 : index
    %10 = vector.load %arg6[%c0_7, %c0_8, %c0_9] : memref<4x128x8xbf16, #tpu.memory_space<vmem>>, vector<1x128x8xbf16>
    %11 = vector.shape_cast %10 : vector<1x128x8xbf16> to vector<128x8xbf16>
    %12 = vector.shape_cast %9 : vector<128x8xbf16> to vector<1x128x8xbf16>
    tpu.vector_store %arg6[%c0_7, %c0_8, %c0_9], %12 {strides = array<i32>} : memref<4x128x8xbf16, #tpu.memory_space<vmem>>, vector<1x128x8xbf16>,
    %c0_10 = arith.constant 0 : index
    %c0_11 = arith.constant 0 : index
    %c0_12 = arith.constant 0 : index
    %13 = vector.load %arg4[%c0_10, %c0_11, %c0_12] : memref<4x32x8xbf16, #tpu.memory_space<vmem>>, vector<1x32x8xbf16>
    %14 = vector.shape_cast %13 : vector<1x32x8xbf16> to vector<32x8xbf16>
    %cst_13 = arith.constant dense<0.000000e+00> : vector<128x8xf32>
    %15 = tpu.matmul %1, %14, %cst_13 {dimension_numbers = #tpu.dot_dimension_numbers<[1], [0], [0], [1], [0, 0, 1, 1], [], []>} : vector<128x32xbf16>, vector<32x8xbf16>, vector<128x8xf32> -> vector<128x8xf32>
    %c0_14 = arith.constant 0 : index
    %c0_15 = arith.constant 0 : index
    %c0_16 = arith.constant 0 : index
    %16 = vector.load %arg5[%c0_14, %c0_15, %c0_16] : memref<4x1x8xf32, #tpu.memory_space<vmem>>, vector<1x1x8xf32>
    %17 = vector.shape_cast %16 : vector<1x1x8xf32> to vector<1x8xf32>
    %18 = vector.broadcast %17 : vector<1x8xf32> to vector<128x8xf32>
    %19 = arith.addf %15, %18 : vector<128x8xf32>
    %20 = arith.truncf %19 : vector<128x8xf32> to vector<128x8xbf16>
    %c0_17 = arith.constant 0 : index
    %c0_18 = arith.constant 0 : index
    %c0_19 = arith.constant 0 : index
    %21 = vector.load %arg7[%c0_17, %c0_18, %c0_19] : memref<4x128x8xbf16, #tpu.memory_space<vmem>>, vector<1x128x8xbf16>
    %22 = vector.shape_cast %21 : vector<1x128x8xbf16> to vector<128x8xbf16>
    %23 = vector.shape_cast %20 : vector<128x8xbf16> to vector<1x128x8xbf16>
    tpu.vector_store %arg7[%c0_17, %c0_18, %c0_19], %23 {strides = array<i32>} : memref<4x128x8xbf16, #tpu.memory_space<vmem>>, vector<1x128x8xbf16>,
    %c1 = arith.constant 1 : index
    %c0_20 = arith.constant 0 : index
    %c0_21 = arith.constant 0 : index
    %24 = vector.load %arg2[%c1, %c0_20, %c0_21] : memref<4x32x8xbf16, #tpu.memory_space<vmem>>, vector<1x32x8xbf16>
    %25 = vector.shape_cast %24 : vector<1x32x8xbf16> to vector<32x8xbf16>
    %cst_22 = arith.constant dense<0.000000e+00> : vector<128x8xf32>
    %26 = tpu.matmul %1, %25, %cst_22 {dimension_numbers = #tpu.dot_dimension_numbers<[1], [0], [0], [1], [0, 0, 1, 1], [], []>} : vector<128x32xbf16>, vector<32x8xbf16>, vector<128x8xf32> -> vector<128x8xf32>
    %c1_23 = arith.constant 1 : index
    %c0_24 = arith.constant 0 : index
    %c0_25 = arith.constant 0 : index
    %27 = vector.load %arg3[%c1_23, %c0_24, %c0_25] : memref<4x1x8xf32, #tpu.memory_space<vmem>>, vector<1x1x8xf32>
    %28 = vector.shape_cast %27 : vector<1x1x8xf32> to vector<1x8xf32>
    %29 = vector.broadcast %28 : vector<1x8xf32> to vector<128x8xf32>
    %30 = arith.addf %26, %29 : vector<128x8xf32>
    %31 = arith.truncf %30 : vector<128x8xf32> to vector<128x8xbf16>
    %c1_26 = arith.constant 1 : index
    %c0_27 = arith.constant 0 : index
    %c0_28 = arith.constant 0 : index
    %32 = vector.load %arg6[%c1_26, %c0_27, %c0_28] : memref<4x128x8xbf16, #tpu.memory_space<vmem>>, vector<1x128x8xbf16>
    %33 = vector.shape_cast %32 : vector<1x128x8xbf16> to vector<128x8xbf16>
    %34 = vector.shape_cast %31 : vector<128x8xbf16> to vector<1x128x8xbf16>
    tpu.vector_store %arg6[%c1_26, %c0_27, %c0_28], %34 {strides = array<i32>} : memref<4x128x8xbf16, #tpu.memory_space<vmem>>, vector<1x128x8xbf16>,
    %c1_29 = arith.constant 1 : index
    %c0_30 = arith.constant 0 : index
    %c0_31 = arith.constant 0 : index
    %35 = vector.load %arg4[%c1_29, %c0_30, %c0_31] : memref<4x32x8xbf16, #tpu.memory_space<vmem>>, vector<1x32x8xbf16>
    %36 = vector.shape_cast %35 : vector<1x32x8xbf16> to vector<32x8xbf16>
    %cst_32 = arith.constant dense<0.000000e+00> : vector<128x8xf32>
    %37 = tpu.matmul %1, %36, %cst_32 {dimension_numbers = #tpu.dot_dimension_numbers<[1], [0], [0], [1], [0, 0, 1, 1], [], []>} : vector<128x32xbf16>, vector<32x8xbf16>, vector<128x8xf32> -> vector<128x8xf32>
    %c1_33 = arith.constant 1 : index
    %c0_34 = arith.constant 0 : index
    %c0_35 = arith.constant 0 : index
    %38 = vector.load %arg5[%c1_33, %c0_34, %c0_35] : memref<4x1x8xf32, #tpu.memory_space<vmem>>, vector<1x1x8xf32>
    %39 = vector.shape_cast %38 : vector<1x1x8xf32> to vector<1x8xf32>
    %40 = vector.broadcast %39 : vector<1x8xf32> to vector<128x8xf32>
    %41 = arith.addf %37, %40 : vector<128x8xf32>
    %42 = arith.truncf %41 : vector<128x8xf32> to vector<128x8xbf16>
    %c1_36 = arith.constant 1 : index
    %c0_37 = arith.constant 0 : index
    %c0_38 = arith.constant 0 : index
    %43 = vector.load %arg7[%c1_36, %c0_37, %c0_38] : memref<4x128x8xbf16, #tpu.memory_space<vmem>>, vector<1x128x8xbf16>
    %44 = vector.shape_cast %43 : vector<1x128x8xbf16> to vector<128x8xbf16>
    %45 = vector.shape_cast %42 : vector<128x8xbf16> to vector<1x128x8xbf16>
    tpu.vector_store %arg7[%c1_36, %c0_37, %c0_38], %45 {strides = array<i32>} : memref<4x128x8xbf16, #tpu.memory_space<vmem>>, vector<1x128x8xbf16>,
    %c2 = arith.constant 2 : index
    %c0_39 = arith.constant 0 : index
    %c0_40 = arith.constant 0 : index
    %46 = vector.load %arg2[%c2, %c0_39, %c0_40] : memref<4x32x8xbf16, #tpu.memory_space<vmem>>, vector<1x32x8xbf16>
    %47 = vector.shape_cast %46 : vector<1x32x8xbf16> to vector<32x8xbf16>
    %cst_41 = arith.constant dense<0.000000e+00> : vector<128x8xf32>
    %48 = tpu.matmul %1, %47, %cst_41 {dimension_numbers = #tpu.dot_dimension_numbers<[1], [0], [0], [1], [0, 0, 1, 1], [], []>} : vector<128x32xbf16>, vector<32x8xbf16>, vector<128x8xf32> -> vector<128x8xf32>
    %c2_42 = arith.constant 2 : index
    %c0_43 = arith.constant 0 : index
    %c0_44 = arith.constant 0 : index
    %49 = vector.load %arg3[%c2_42, %c0_43, %c0_44] : memref<4x1x8xf32, #tpu.memory_space<vmem>>, vector<1x1x8xf32>
    %50 = vector.shape_cast %49 : vector<1x1x8xf32> to vector<1x8xf32>
    %51 = vector.broadcast %50 : vector<1x8xf32> to vector<128x8xf32>
    %52 = arith.addf %48, %51 : vector<128x8xf32>
    %53 = arith.truncf %52 : vector<128x8xf32> to vector<128x8xbf16>
    %c2_45 = arith.constant 2 : index
    %c0_46 = arith.constant 0 : index
    %c0_47 = arith.constant 0 : index
    %54 = vector.load %arg6[%c2_45, %c0_46, %c0_47] : memref<4x128x8xbf16, #tpu.memory_space<vmem>>, vector<1x128x8xbf16>
    %55 = vector.shape_cast %54 : vector<1x128x8xbf16> to vector<128x8xbf16>
    %56 = vector.shape_cast %53 : vector<128x8xbf16> to vector<1x128x8xbf16>
    tpu.vector_store %arg6[%c2_45, %c0_46, %c0_47], %56 {strides = array<i32>} : memref<4x128x8xbf16, #tpu.memory_space<vmem>>, vector<1x128x8xbf16>,
    %c2_48 = arith.constant 2 : index
    %c0_49 = arith.constant 0 : index
    %c0_50 = arith.constant 0 : index
    %57 = vector.load %arg4[%c2_48, %c0_49, %c0_50] : memref<4x32x8xbf16, #tpu.memory_space<vmem>>, vector<1x32x8xbf16>
    %58 = vector.shape_cast %57 : vector<1x32x8xbf16> to vector<32x8xbf16>
    %cst_51 = arith.constant dense<0.000000e+00> : vector<128x8xf32>
    %59 = tpu.matmul %1, %58, %cst_51 {dimension_numbers = #tpu.dot_dimension_numbers<[1], [0], [0], [1], [0, 0, 1, 1], [], []>} : vector<128x32xbf16>, vector<32x8xbf16>, vector<128x8xf32> -> vector<128x8xf32>
    %c2_52 = arith.constant 2 : index
    %c0_53 = arith.constant 0 : index
    %c0_54 = arith.constant 0 : index
    %60 = vector.load %arg5[%c2_52, %c0_53, %c0_54] : memref<4x1x8xf32, #tpu.memory_space<vmem>>, vector<1x1x8xf32>
    %61 = vector.shape_cast %60 : vector<1x1x8xf32> to vector<1x8xf32>
    %62 = vector.broadcast %61 : vector<1x8xf32> to vector<128x8xf32>
    %63 = arith.addf %59, %62 : vector<128x8xf32>
    %64 = arith.truncf %63 : vector<128x8xf32> to vector<128x8xbf16>
    %c2_55 = arith.constant 2 : index
    %c0_56 = arith.constant 0 : index
    %c0_57 = arith.constant 0 : index
    %65 = vector.load %arg7[%c2_55, %c0_56, %c0_57] : memref<4x128x8xbf16, #tpu.memory_space<vmem>>, vector<1x128x8xbf16>
    %66 = vector.shape_cast %65 : vector<1x128x8xbf16> to vector<128x8xbf16>
    %67 = vector.shape_cast %64 : vector<128x8xbf16> to vector<1x128x8xbf16>
    tpu.vector_store %arg7[%c2_55, %c0_56, %c0_57], %67 {strides = array<i32>} : memref<4x128x8xbf16, #tpu.memory_space<vmem>>, vector<1x128x8xbf16>,
    %c3 = arith.constant 3 : index
    %c0_58 = arith.constant 0 : index
    %c0_59 = arith.constant 0 : index
    %68 = vector.load %arg2[%c3, %c0_58, %c0_59] : memref<4x32x8xbf16, #tpu.memory_space<vmem>>, vector<1x32x8xbf16>
    %69 = vector.shape_cast %68 : vector<1x32x8xbf16> to vector<32x8xbf16>
    %cst_60 = arith.constant dense<0.000000e+00> : vector<128x8xf32>
    %70 = tpu.matmul %1, %69, %cst_60 {dimension_numbers = #tpu.dot_dimension_numbers<[1], [0], [0], [1], [0, 0, 1, 1], [], []>} : vector<128x32xbf16>, vector<32x8xbf16>, vector<128x8xf32> -> vector<128x8xf32>
    %c3_61 = arith.constant 3 : index
    %c0_62 = arith.constant 0 : index
    %c0_63 = arith.constant 0 : index
    %71 = vector.load %arg3[%c3_61, %c0_62, %c0_63] : memref<4x1x8xf32, #tpu.memory_space<vmem>>, vector<1x1x8xf32>
    %72 = vector.shape_cast %71 : vector<1x1x8xf32> to vector<1x8xf32>
    %73 = vector.broadcast %72 : vector<1x8xf32> to vector<128x8xf32>
    %74 = arith.addf %70, %73 : vector<128x8xf32>
    %75 = arith.truncf %74 : vector<128x8xf32> to vector<128x8xbf16>
    %c3_64 = arith.constant 3 : index
    %c0_65 = arith.constant 0 : index
    %c0_66 = arith.constant 0 : index
    %76 = vector.load %arg6[%c3_64, %c0_65, %c0_66] : memref<4x128x8xbf16, #tpu.memory_space<vmem>>, vector<1x128x8xbf16>
    %77 = vector.shape_cast %76 : vector<1x128x8xbf16> to vector<128x8xbf16>
    %78 = vector.shape_cast %75 : vector<128x8xbf16> to vector<1x128x8xbf16>
    tpu.vector_store %arg6[%c3_64, %c0_65, %c0_66], %78 {strides = array<i32>} : memref<4x128x8xbf16, #tpu.memory_space<vmem>>, vector<1x128x8xbf16>,
    %c3_67 = arith.constant 3 : index
    %c0_68 = arith.constant 0 : index
    %c0_69 = arith.constant 0 : index
    %79 = vector.load %arg4[%c3_67, %c0_68, %c0_69] : memref<4x32x8xbf16, #tpu.memory_space<vmem>>, vector<1x32x8xbf16>
    %80 = vector.shape_cast %79 : vector<1x32x8xbf16> to vector<32x8xbf16>
    %cst_70 = arith.constant dense<0.000000e+00> : vector<128x8xf32>
    %81 = tpu.matmul %1, %80, %cst_70 {dimension_numbers = #tpu.dot_dimension_numbers<[1], [0], [0], [1], [0, 0, 1, 1], [], []>} : vector<128x32xbf16>, vector<32x8xbf16>, vector<128x8xf32> -> vector<128x8xf32>
    %c3_71 = arith.constant 3 : index
    %c0_72 = arith.constant 0 : index
    %c0_73 = arith.constant 0 : index
    %82 = vector.load %arg5[%c3_71, %c0_72, %c0_73] : memref<4x1x8xf32, #tpu.memory_space<vmem>>, vector<1x1x8xf32>
    %83 = vector.shape_cast %82 : vector<1x1x8xf32> to vector<1x8xf32>
    %84 = vector.broadcast %83 : vector<1x8xf32> to vector<128x8xf32>
    %85 = arith.addf %81, %84 : vector<128x8xf32>
    %86 = arith.truncf %85 : vector<128x8xf32> to vector<128x8xbf16>
    %c3_74 = arith.constant 3 : index
    %c0_75 = arith.constant 0 : index
    %c0_76 = arith.constant 0 : index
    %87 = vector.load %arg7[%c3_74, %c0_75, %c0_76] : memref<4x128x8xbf16, #tpu.memory_space<vmem>>, vector<1x128x8xbf16>
    %88 = vector.shape_cast %87 : vector<1x128x8xbf16> to vector<128x8xbf16>
    %89 = vector.shape_cast %86 : vector<128x8xbf16> to vector<1x128x8xbf16>
    tpu.vector_store %arg7[%c3_74, %c0_75, %c0_76], %89 {strides = array<i32>} : memref<4x128x8xbf16, #tpu.memory_space<vmem>>, vector<1x128x8xbf16>,
    return
  }
  func.func @transform_0(%arg0: i32) -> (i32, i32) {
    %c0_i32 = arith.constant 0 : i32
    %c0_i32_0 = arith.constant 0 : i32
    return %arg0, %c0_i32 : i32, i32
  }
  func.func @transform_1(%arg0: i32) -> (i32, i32, i32) {
    %c0_i32 = arith.constant 0 : i32
    %c0_i32_0 = arith.constant 0 : i32
    %c0_i32_1 = arith.constant 0 : i32
    %c0_i32_2 = arith.constant 0 : i32
    return %c0_i32, %c0_i32_0, %c0_i32_1 : i32, i32, i32
  }
  func.func @transform_2(%arg0: i32) -> (i32, i32, i32) {
    %c0_i32 = arith.constant 0 : i32
    %c0_i32_0 = arith.constant 0 : i32
    %c0_i32_1 = arith.constant 0 : i32
    %c0_i32_2 = arith.constant 0 : i32
    return %c0_i32, %c0_i32_0, %c0_i32_1 : i32, i32, i32
  }
  func.func @transform_3(%arg0: i32) -> (i32, i32, i32) {
    %c0_i32 = arith.constant 0 : i32
    %c0_i32_0 = arith.constant 0 : i32
    %c0_i32_1 = arith.constant 0 : i32
    %c0_i32_2 = arith.constant 0 : i32
    return %c0_i32, %c0_i32_0, %c0_i32_1 : i32, i32, i32
  }
  func.func @transform_4(%arg0: i32) -> (i32, i32, i32) {
    %c0_i32 = arith.constant 0 : i32
    %c0_i32_0 = arith.constant 0 : i32
    %c0_i32_1 = arith.constant 0 : i32
    %c0_i32_2 = arith.constant 0 : i32
    return %c0_i32, %c0_i32_0, %c0_i32_1 : i32, i32, i32
  }
  func.func @transform_5(%arg0: i32) -> (i32, i32, i32) {
    %c0_i32 = arith.constant 0 : i32
    %c0_i32_0 = arith.constant 0 : i32
    %c0_i32_1 = arith.constant 0 : i32
    return %c0_i32, %arg0, %c0_i32_0 : i32, i32, i32
  }
  func.func @transform_6(%arg0: i32) -> (i32, i32, i32) {
    %c0_i32 = arith.constant 0 : i32
    %c0_i32_0 = arith.constant 0 : i32
    %c0_i32_1 = arith.constant 0 : i32
    return %c0_i32, %arg0, %c0_i32_0 : i32, i32, i32
  }
}

</mosaic_0001>

<bundles_post_ra>
// kernel: tpu_custom_call.1
= control target key start
LH: loop header
LB: loop body
LE: loop exit
PB: predicated region body
PF: predicated region fallthrough
CT: control target
= control target key end

     0   :  { %s2198_s21 = smov 0   ;;  %s2200_s22 = smov 0   ;;  %s3024_s0 = inlined_call_operand.vmem [shape: f32[384,32], index: 0, kind: input, shape index: {}]   ;;  %s3025_s1 = inlined_call_operand.vmem [shape: bf16[4,32,8], index: 1, kind: input, shape index: {}]   ;;  %s3026_s2 = inlined_call_operand.vmem [shape: f32[4,1,8], index: 2, kind: input, shape index: {}]   ;;  %s3027_s3 = inlined_call_operand.vmem [shape: bf16[4,32,8], index: 3, kind: input, shape index: {}]   ;;  %s3028_s4 = inlined_call_operand.vmem [shape: f32[4,1,8], index: 4, kind: input, shape index: {}]   ;;  %s3029_s5 = inlined_call_operand.vmem [shape: bf16[4,384,8], index: 5, kind: output, shape index: {0}]   ;;  %s3030_s6 = inlined_call_operand.vmem [shape: bf16[4,384,8], index: 6, kind: output, shape index: {1}]  }
   0x1   :  { %s2202_s23 = smov 0  }
   0x2 LB: > { %s2211_s24 = sadd.s32 4294967295, %s2161_s23   ;;  %s2213_s25 = sadd.s32 1, %s2161_s23   ;;  %s2161_s23 = sphi %s2202_s23, %s3034_s23   ;;  %s2157_s22 = sphi %s2200_s22, %s3033_s22   ;;  %s2153_s21 = sphi %s2198_s21, %s3032_s21  }
   0x3   : > { %s131_s26 = ssub.s32 %s2161_s23, %s2213_s25  ;;  %s134_s27 = sadd.s32 1, %s2157_s22 }
   0x4   : > { %p132_p0 = scmp.eq.s32.totalorder %s131_s26, 0  ;;  %p144_p1 = scmp.ne.s32.totalorder %s2157_s22, %s2153_s21 }
   0x5   : > { %p145_p2 = scmp.eq.s32.totalorder %s2211_s24, 2  ;;  %p1822_p3 = scmp.ge.s32.totalorder %s2161_s23, 1 }
   0x6   : > { %s2221_s28 = scalar_select %p132_p0, %s2157_s22, %s134_s27  }
   0x7   : > { %p2223_p4 = por %p145_p2, %p144_p1  ;;  %p216_p5 = scmp.lt.s32.totalorder %s2161_s23, 4 }
   0x9   : > { %p217_p6 = pnand %p1822_p3, %p216_p5 }
   0xa   : > { %s1825_s12 = sshll.u32 (!%p217_p6), %s2211_s24, 4  ;;  %s240_s7 = sand.u32 (!%p217_p6), 1, %s2153_s21  }
   0xb   : > { %220 = sbr.rel (%p217_p6) target bundleno = 455 (0x1c7), region = 40  ;;  %p250_p7 = scmp.lt.s32.totalorder (!%p217_p6), %s1825_s12, 47 }
   0xc   : > { %s1823_s13 = sshll.u32 (!%p217_p6), %s240_s7, 8 }
  0x10   : > { %v2090_v0 = vld [vmem:[%s3025_s1 + $0x8] sm:$0xff]  ;;  %v2094_v2 = vld [vmem:[%s3025_s1 + $0x18] sm:$0xff]  ;;  %v2089_v4 = vld [vmem:[%s3025_s1] sm:$0xff]  ;;  %s3036_s12 = smov (!%p250_p7, %s1825_s12), 47  ;;  %vm302_vm0 = vcmask 261120   ;;  %vm392_vm1 = vcmask 60416  }
  0x11   : > { %v2092_v1 = vld [vmem:[%s3027_s3 + $0x8] sm:$0xff]  ;;  %v2096_v3 = vld [vmem:[%s3027_s3 + $0x18] sm:$0xff]  ;;  %333 = vmatpush.bf16.msra.mxu0 %v2090_v0  ;;  %v2091_v5 = vld [vmem:[%s3027_s3] sm:$0xff]  ;;  %538 = vmatpush.bf16.msra.mxu2 %v2094_v2  ;;  %s1826_s11 = sshll.u32 %s3036_s12, 3  ;;  %s2412_s12 = scalar_lea.vmem [#allocation3], %s1823_s13 }
  0x12   : > { %435 = vmatpush.bf16.msra.mxu1 %v2092_v1  ;;  %v2093_v6 = vld [vmem:[%s3025_s1 + $0x10] sm:$0xff]  ;;  %642 = vmatpush.bf16.msra.mxu3 %v2096_v3  ;;  %v2102_v8 = vld [vmem:[%s3025_s1 + $0x38] sm:$0xff]  ;;  %v2098_v10 = vld [vmem:[%s3025_s1 + $0x28] sm:$0xff]  ;;  %s2267_s17 = scalar_lea.vmem %s3024_s0, %s1826_s11  ;;  %s2105_s8 = sshll.u32 (%p2223_p4), %s2211_s24, 6 }
  0x13   : > { %v2095_v7 = vld [vmem:[%s3027_s3 + $0x10] sm:$0xff]  ;;  %v2104_v9 = vld [vmem:[%s3027_s3 + $0x38] sm:$0xff]  ;;  %v2100_v11 = vld [vmem:[%s3027_s3 + $0x28] sm:$0xff]  ;;  %s2878_s11 = scalar_lea.vmem (%p2223_p4), %s3029_s5, %s2105_s8 }
  0x14   : > { %v258_v12 = vld [vmem:[%s2267_s17] sm:$0xff]  ;;  %v259_v13 = vld [vmem:[%s2267_s17 + $0x8] sm:$0xff]  ;;  %v260_v15 = vld [vmem:[%s2267_s17 + $0x10] sm:$0xff] }
  0x15   : > { %334 = vmatpush.bf16.msra.mxu0 %v2089_v4  ;;  %539 = vmatpush.bf16.msra.mxu2 %v2093_v6  ;;  %v2271_v14 = vpack.c.bf16 %v259_v13, %v258_v12  ;;  %v261_v16 = vld [vmem:[%s2267_s17 + $0x18] sm:$0xff]  ;;  %v262_v18 = vld [vmem:[%s2267_s17 + $0x20] sm:$0xff]  ;;  %v263_v19 = vld [vmem:[%s2267_s17 + $0x28] sm:$0xff] }
  0x16   : > { %436 = vmatpush.bf16.msra.mxu1 %v2091_v5  ;;  %643 = vmatpush.bf16.msra.mxu3 %v2095_v7  ;;  %v2283_v17 = vpack.c.bf16 %v261_v16, %v260_v15  ;;  %v2295_v20 = vpack.c.bf16 %v263_v19, %v262_v18  ;;  %v2101_v21 = vld [vmem:[%s3025_s1 + $0x30] sm:$0xff]  ;;  %v2097_v23 = vld [vmem:[%s3025_s1 + $0x20] sm:$0xff]  ;;  %v265_v26 = vld [vmem:[%s2267_s17 + $0x38] sm:$0xff] }
  0x17   : > { %v2103_v22 = vld [vmem:[%s3027_s3 + $0x30] sm:$0xff]  ;;  %v2099_v24 = vld [vmem:[%s3027_s3 + $0x20] sm:$0xff]  ;;  %v267_v29 = vld [vmem:[%s2267_s17 + $0x48] sm:$0xff] }
  0x18   : > { %1835 = vmatmul.msk.bf16.vlgmr.msra.gmra.mxu0 %vm302_vm0, %v2271_v14  ;;  %1872 = vmatmul.msk.bf16.vlgmr.msra.gmra.mxu2 %vm302_vm0, %v2271_v14  ;;  %v264_v25 = vld [vmem:[%s2267_s17 + $0x30] sm:$0xff]  ;;  %v266_v28 = vld [vmem:[%s2267_s17 + $0x40] sm:$0xff]  ;;  %v269_v32 = vld [vmem:[%s2267_s17 + $0x58] sm:$0xff] }
  0x19   : > { %954 = vmatpush.bf16.msrb.mxu2 %v2102_v8  ;;  %746 = vmatpush.bf16.msrb.mxu0 %v2098_v10  ;;  %v2319_v27 = vpack.c.bf16 %v265_v26, %v264_v25  ;;  %v2331_v30 = vpack.c.bf16 %v267_v29, %v266_v28  ;;  %v268_v31 = vld [vmem:[%s2267_s17 + $0x50] sm:$0xff]  ;;  %v270_v34 = vld [vmem:[%s2267_s17 + $0x60] sm:$0xff]  ;;  %v271_v35 = vld [vmem:[%s2267_s17 + $0x68] sm:$0xff] }
  0x1a   : > { %1058 = vmatpush.bf16.msrb.mxu3 %v2104_v9  ;;  %850 = vmatpush.bf16.msrb.mxu1 %v2100_v11  ;;  %v2343_v33 = vpack.c.bf16 %v269_v32, %v268_v31  ;;  %v2355_v36 = vpack.c.bf16 %v271_v35, %v270_v34  ;;  %v272_v37 = vld [vmem:[%s2267_s17 + $0x70] sm:$0xff]  ;;  %v273_v38 = vld [vmem:[%s2267_s17 + $0x78] sm:$0xff]  ;;  %v2381_v40 = vld [vmem:[%s3026_s2] ss:$0 sm:$0xff]  ;;  %s2408_s17 = scalar_lea.vmem [#allocation2], %s1823_s13 }
  0x1b   : > { %1851 = vmatmul.msk.bf16.vlgmr.msra.gmra.mxu1 %vm302_vm0, %v2271_v14  ;;  %1909 = vmatmul.msk.bf16.vlgmr.msra.gmra.mxu3 %vm302_vm0, %v2271_v14  ;;  %v2367_v39 = vpack.c.bf16 %v273_v38, %v272_v37  ;;  %v2386_v41 = vld [vmem:[%s3028_s4] ss:$0 sm:$0xff]  ;;  %v2401_v48 = vld [vmem:[%s3026_s2 + $0x1] ss:$0 sm:$0xff] }
  0x1c   : > { %v2406_v49 = vld [vmem:[%s3028_s4 + $0x1] ss:$0 sm:$0xff] }
  0x1d   : > { %955 = vmatpush.bf16.msrb.mxu2 %v2101_v21  ;;  %747 = vmatpush.bf16.msrb.mxu0 %v2097_v23 }
  0x1e   : > { %1059 = vmatpush.bf16.msrb.mxu3 %v2103_v22  ;;  %851 = vmatpush.bf16.msrb.mxu1 %v2099_v24 }
  0x28   : > { %1836 = vmatmul.msk.bf16.gmra.mxu0 %vm302_vm0, %v2283_v17  ;;  %1873 = vmatmul.msk.bf16.gmra.mxu2 %vm302_vm0, %v2283_v17 }
  0x2b   : > { %1852 = vmatmul.msk.bf16.gmra.mxu1 %vm302_vm0, %v2283_v17  ;;  %1910 = vmatmul.msk.bf16.gmra.mxu3 %vm302_vm0, %v2283_v17 }
  0x38   : > { %1837 = vmatmul.msk.bf16.gmra.mxu0 %vm302_vm0, %v2295_v20  ;;  %1874 = vmatmul.msk.bf16.gmra.mxu2 %vm302_vm0, %v2295_v20 }
  0x3b   : > { %1853 = vmatmul.msk.bf16.gmra.mxu1 %vm302_vm0, %v2295_v20  ;;  %1911 = vmatmul.msk.bf16.gmra.mxu3 %vm302_vm0, %v2295_v20 }
  0x48   : > { %1838 = vmatmul.msk.bf16.gmra.mxu0 %vm302_vm0, %v2319_v27  ;;  %1875 = vmatmul.msk.bf16.gmra.mxu2 %vm302_vm0, %v2319_v27 }
  0x4b   : > { %1854 = vmatmul.msk.bf16.gmra.mxu1 %vm302_vm0, %v2319_v27  ;;  %1912 = vmatmul.msk.bf16.gmra.mxu3 %vm302_vm0, %v2319_v27 }
  0x58   : > { %1839 = vmatmul.msk.bf16.gmra.mxu0 %vm302_vm0, %v2331_v30  ;;  %1876 = vmatmul.msk.bf16.gmra.mxu2 %vm302_vm0, %v2331_v30 }
  0x5b   : > { %1855 = vmatmul.msk.bf16.gmra.mxu1 %vm302_vm0, %v2331_v30  ;;  %1913 = vmatmul.msk.bf16.gmra.mxu3 %vm302_vm0, %v2331_v30 }
  0x68   : > { %1840 = vmatmul.msk.bf16.gmra.mxu0 %vm302_vm0, %v2343_v33  ;;  %1877 = vmatmul.msk.bf16.gmra.mxu2 %vm302_vm0, %v2343_v33 }
  0x6b   : > { %1856 = vmatmul.msk.bf16.gmra.mxu1 %vm302_vm0, %v2343_v33  ;;  %1914 = vmatmul.msk.bf16.gmra.mxu3 %vm302_vm0, %v2343_v33 }
  0x78   : > { %1841 = vmatmul.msk.bf16.gmra.mxu0 %vm302_vm0, %v2355_v36  ;;  %1878 = vmatmul.msk.bf16.gmra.mxu2 %vm302_vm0, %v2355_v36 }
  0x7b   : > { %1857 = vmatmul.msk.bf16.gmra.mxu1 %vm302_vm0, %v2355_v36  ;;  %1915 = vmatmul.msk.bf16.gmra.mxu3 %vm302_vm0, %v2355_v36 }
  0x88   : > { %1842 = vmatmul.msk.bf16.gmra.mxu0 %vm302_vm0, %v2367_v39  ;;  %1879 = vmatmul.msk.bf16.gmra.mxu2 %vm302_vm0, %v2367_v39 }
  0x8b   : > { %1858 = vmatmul.msk.bf16.gmra.mxu1 %vm302_vm0, %v2367_v39  ;;  %1916 = vmatmul.msk.bf16.gmra.mxu3 %vm302_vm0, %v2367_v39 }
  0x95   : > { %v336_v42 = vpop.f32.mrf.mxu0 }
  0x96   : > { %v337_v44 = vadd.f32 %v2381_v40, %v336_v42 }
  0x98   : > { %v438_v43 = vpop.f32.mrf.mxu1  ;;  %v376_v46 = vpack.c.bf16 %v337_v44, %v337_v44  ;;  %1946 = vmatmul.msk.bf16.vlgmr.msrb.gmra.mxu0 %vm302_vm0, %v2271_v14  ;;  %2020 = vmatmul.msk.bf16.vlgmr.msrb.gmra.mxu2 %vm302_vm0, %v2271_v14 }
  0x99   : > { %v439_v45 = vadd.f32 %v2386_v41, %v438_v43 }
  0x9a   : > { %393 = vst.msk [vmem:[%s2408_s17] sm:$0xf] %vm392_vm1, %v376_v46 }
  0x9b   : > { %v478_v47 = vpack.c.bf16 %v439_v45, %v439_v45  ;;  %1983 = vmatmul.msk.bf16.vlgmr.msrb.gmra.mxu1 %vm302_vm0, %v2271_v14  ;;  %2057 = vmatmul.msk.bf16.vlgmr.msrb.gmra.mxu3 %vm302_vm0, %v2271_v14  ;;  %v541_v50 = vpop.f32.mrf.mxu2 }
  0x9c   : > { %v542_v52 = vadd.f32 %v2401_v48, %v541_v50 }
  0x9d   : > { %494 = vst.msk [vmem:[%s2412_s12] sm:$0xf] %vm392_vm1, %v478_v47  ;;  %v338_v54 = vpop.f32.mrf.mxu0 }
  0x9e   : > { %v645_v51 = vpop.f32.mrf.mxu3  ;;  %v339_v56 = vadd.f32 %v2381_v40, %v338_v54  ;;  %v581_v58 = vpack.c.bf16 %v542_v52, %v542_v52 }
  0x9f   : > { %v646_v53 = vadd.f32 %v2406_v49, %v645_v51 }
  0xa0   : > { %v440_v55 = vpop.f32.mrf.mxu1  ;;  %v377_v60 = vpack.c.bf16 %v339_v56, %v339_v56  ;;  %1880 = vst.msk [vmem:[%s2408_s17 + $0x40] sm:$0xf] %vm392_vm1, %v581_v58 }
  0xa1   : > { %v441_v57 = vadd.f32 %v2386_v41, %v440_v55  ;;  %v685_v59 = vpack.c.bf16 %v646_v53, %v646_v53 }
  0xa2   : > { %394 = vst.msk [vmem:[%s2408_s17 + $0x4] sm:$0xf] %vm392_vm1, %v377_v60 }
  0xa3   : > { %v479_v61 = vpack.c.bf16 %v441_v57, %v441_v57  ;;  %1917 = vst.msk [vmem:[%s2412_s12 + $0x40] sm:$0xf] %vm392_vm1, %v685_v59  ;;  %v543_v62 = vpop.f32.mrf.mxu2 }
  0xa4   : > { %v544_v0 = vadd.f32 %v2401_v48, %v543_v62 }
  0xa5   : > { %495 = vst.msk [vmem:[%s2412_s12 + $0x4] sm:$0xf] %vm392_vm1, %v479_v61  ;;  %v341_v2 = vpop.f32.mrf.mxu0 }
  0xa6   : > { %v647_v63 = vpop.f32.mrf.mxu3  ;;  %v342_v4 = vadd.f32 %v2381_v40, %v341_v2  ;;  %v582_v6 = vpack.c.bf16 %v544_v0, %v544_v0 }
  0xa7   : > { %v648_v1 = vadd.f32 %v2406_v49, %v647_v63 }
  0xa8   : > { %v443_v3 = vpop.f32.mrf.mxu1  ;;  %v378_v8 = vpack.c.bf16 %v342_v4, %v342_v4  ;;  %1947 = vmatmul.msk.bf16.gmra.mxu0 %vm302_vm0, %v2283_v17  ;;  %1881 = vst.msk [vmem:[%s2408_s17 + $0x44] sm:$0xf] %vm392_vm1, %v582_v6  ;;  %2021 = vmatmul.msk.bf16.gmra.mxu2 %vm302_vm0, %v2283_v17 }
  0xa9   : > { %v444_v5 = vadd.f32 %v2386_v41, %v443_v3  ;;  %v686_v7 = vpack.c.bf16 %v648_v1, %v648_v1 }
  0xaa   : > { %395 = vst.msk [vmem:[%s2408_s17 + $0x8] sm:$0xf] %vm392_vm1, %v378_v8 }
  0xab   : > { %v480_v9 = vpack.c.bf16 %v444_v5, %v444_v5  ;;  %1984 = vmatmul.msk.bf16.gmra.mxu1 %vm302_vm0, %v2283_v17  ;;  %2058 = vmatmul.msk.bf16.gmra.mxu3 %vm302_vm0, %v2283_v17  ;;  %1918 = vst.msk [vmem:[%s2412_s12 + $0x44] sm:$0xf] %vm392_vm1, %v686_v7  ;;  %v546_v10 = vpop.f32.mrf.mxu2 }
  0xac   : > { %v547_v12 = vadd.f32 %v2401_v48, %v546_v10 }
  0xad   : > { %496 = vst.msk [vmem:[%s2412_s12 + $0x8] sm:$0xf] %vm392_vm1, %v480_v9  ;;  %v343_v14 = vpop.f32.mrf.mxu0 }
  0xae   : > { %v650_v11 = vpop.f32.mrf.mxu3  ;;  %v344_v16 = vadd.f32 %v2381_v40, %v343_v14  ;;  %v583_v18 = vpack.c.bf16 %v547_v12, %v547_v12 }
  0xaf   : > { %v651_v13 = vadd.f32 %v2406_v49, %v650_v11 }
  0xb0   : > { %v445_v15 = vpop.f32.mrf.mxu1  ;;  %v379_v21 = vpack.c.bf16 %v344_v16, %v344_v16  ;;  %1882 = vst.msk [vmem:[%s2408_s17 + $0x48] sm:$0xf] %vm392_vm1, %v583_v18 }
  0xb1   : > { %v446_v17 = vadd.f32 %v2386_v41, %v445_v15  ;;  %v687_v19 = vpack.c.bf16 %v651_v13, %v651_v13 }
  0xb2   : > { %396 = vst.msk [vmem:[%s2408_s17 + $0xc] sm:$0xf] %vm392_vm1, %v379_v21 }
  0xb3   : > { %v481_v22 = vpack.c.bf16 %v446_v17, %v446_v17  ;;  %1919 = vst.msk [vmem:[%s2412_s12 + $0x48] sm:$0xf] %vm392_vm1, %v687_v19  ;;  %v548_v23 = vpop.f32.mrf.mxu2 }
  0xb4   : > { %v549_v25 = vadd.f32 %v2401_v48, %v548_v23 }
  0xb5   : > { %497 = vst.msk [vmem:[%s2412_s12 + $0xc] sm:$0xf] %vm392_vm1, %v481_v22  ;;  %v346_v28 = vpop.f32.mrf.mxu0 }
  0xb6   : > { %v652_v24 = vpop.f32.mrf.mxu3  ;;  %v347_v31 = vadd.f32 %v2381_v40, %v346_v28  ;;  %v584_v34 = vpack.c.bf16 %v549_v25, %v549_v25 }
  0xb7   : > { %v653_v26 = vadd.f32 %v2406_v49, %v652_v24 }
  0xb8   : > { %v448_v29 = vpop.f32.mrf.mxu1  ;;  %v380_v37 = vpack.c.bf16 %v347_v31, %v347_v31  ;;  %1948 = vmatmul.msk.bf16.gmra.mxu0 %vm302_vm0, %v2295_v20  ;;  %1883 = vst.msk [vmem:[%s2408_s17 + $0x4c] sm:$0xf] %vm392_vm1, %v584_v34  ;;  %2022 = vmatmul.msk.bf16.gmra.mxu2 %vm302_vm0, %v2295_v20 }
  0xb9   : > { %v449_v32 = vadd.f32 %v2386_v41, %v448_v29  ;;  %v688_v35 = vpack.c.bf16 %v653_v26, %v653_v26 }
  0xba   : > { %397 = vst.msk [vmem:[%s2408_s17 + $0x10] sm:$0xf] %vm392_vm1, %v380_v37 }
  0xbb   : > { %v482_v38 = vpack.c.bf16 %v449_v32, %v449_v32  ;;  %1985 = vmatmul.msk.bf16.gmra.mxu1 %vm302_vm0, %v2295_v20  ;;  %2059 = vmatmul.msk.bf16.gmra.mxu3 %vm302_vm0, %v2295_v20  ;;  %1920 = vst.msk [vmem:[%s2412_s12 + $0x4c] sm:$0xf] %vm392_vm1, %v688_v35  ;;  %v551_v42 = vpop.f32.mrf.mxu2 }
  0xbc   : > { %v552_v44 = vadd.f32 %v2401_v48, %v551_v42 }
  0xbd   : > { %498 = vst.msk [vmem:[%s2412_s12 + $0x10] sm:$0xf] %vm392_vm1, %v482_v38  ;;  %v348_v46 = vpop.f32.mrf.mxu0 }
  0xbe   : > { %v655_v43 = vpop.f32.mrf.mxu3  ;;  %v349_v20 = vadd.f32 %v2381_v40, %v348_v46  ;;  %v585_v51 = vpack.c.bf16 %v552_v44, %v552_v44 }
  0xbf   : > { %v656_v45 = vadd.f32 %v2406_v49, %v655_v43 }
  0xc0   : > { %v450_v47 = vpop.f32.mrf.mxu1  ;;  %v381_v53 = vpack.c.bf16 %v349_v20, %v349_v20  ;;  %1884 = vst.msk [vmem:[%s2408_s17 + $0x50] sm:$0xf] %vm392_vm1, %v585_v51 }
  0xc1   : > { %v451_v50 = vadd.f32 %v2386_v41, %v450_v47  ;;  %v689_v52 = vpack.c.bf16 %v656_v45, %v656_v45 }
  0xc2   : > { %398 = vst.msk [vmem:[%s2408_s17 + $0x14] sm:$0xf] %vm392_vm1, %v381_v53 }
  0xc3   : > { %v483_v54 = vpack.c.bf16 %v451_v50, %v451_v50  ;;  %1921 = vst.msk [vmem:[%s2412_s12 + $0x50] sm:$0xf] %vm392_vm1, %v689_v52  ;;  %v553_v55 = vpop.f32.mrf.mxu2 }
  0xc4   : > { %v554_v57 = vadd.f32 %v2401_v48, %v553_v55 }
  0xc5   : > { %499 = vst.msk [vmem:[%s2412_s12 + $0x14] sm:$0xf] %vm392_vm1, %v483_v54  ;;  %v351_v59 = vpop.f32.mrf.mxu0 }
  0xc6   : > { %v657_v56 = vpop.f32.mrf.mxu3  ;;  %v352_v61 = vadd.f32 %v2381_v40, %v351_v59  ;;  %v586_v63 = vpack.c.bf16 %v554_v57, %v554_v57 }
  0xc7   : > { %v658_v58 = vadd.f32 %v2406_v49, %v657_v56 }
  0xc8   : > { %v453_v60 = vpop.f32.mrf.mxu1  ;;  %v382_v1 = vpack.c.bf16 %v352_v61, %v352_v61  ;;  %1949 = vmatmul.msk.bf16.gmra.mxu0 %vm302_vm0, %v2319_v27  ;;  %1885 = vst.msk [vmem:[%s2408_s17 + $0x54] sm:$0xf] %vm392_vm1, %v586_v63  ;;  %2023 = vmatmul.msk.bf16.gmra.mxu2 %vm302_vm0, %v2319_v27 }
  0xc9   : > { %v454_v62 = vadd.f32 %v2386_v41, %v453_v60  ;;  %v690_v0 = vpack.c.bf16 %v658_v58, %v658_v58 }
  0xca   : > { %399 = vst.msk [vmem:[%s2408_s17 + $0x18] sm:$0xf] %vm392_vm1, %v382_v1 }
  0xcb   : > { %v484_v2 = vpack.c.bf16 %v454_v62, %v454_v62  ;;  %1986 = vmatmul.msk.bf16.gmra.mxu1 %vm302_vm0, %v2319_v27  ;;  %2060 = vmatmul.msk.bf16.gmra.mxu3 %vm302_vm0, %v2319_v27  ;;  %1922 = vst.msk [vmem:[%s2412_s12 + $0x54] sm:$0xf] %vm392_vm1, %v690_v0  ;;  %v556_v3 = vpop.f32.mrf.mxu2 }
  0xcc   : > { %v557_v5 = vadd.f32 %v2401_v48, %v556_v3 }
  0xcd   : > { %500 = vst.msk [vmem:[%s2412_s12 + $0x18] sm:$0xf] %vm392_vm1, %v484_v2  ;;  %v353_v7 = vpop.f32.mrf.mxu0 }
  0xce   : > { %v660_v4 = vpop.f32.mrf.mxu3  ;;  %v354_v27 = vadd.f32 %v2381_v40, %v353_v7  ;;  %v587_v10 = vpack.c.bf16 %v557_v5, %v557_v5 }
  0xcf   : > { %v661_v6 = vadd.f32 %v2406_v49, %v660_v4 }
  0xd0   : > { %v455_v8 = vpop.f32.mrf.mxu1  ;;  %v383_v12 = vpack.c.bf16 %v354_v27, %v354_v27  ;;  %1886 = vst.msk [vmem:[%s2408_s17 + $0x58] sm:$0xf] %vm392_vm1, %v587_v10 }
  0xd1   : > { %v456_v9 = vadd.f32 %v2386_v41, %v455_v8  ;;  %v691_v11 = vpack.c.bf16 %v661_v6, %v661_v6 }
  0xd2   : > { %400 = vst.msk [vmem:[%s2408_s17 + $0x1c] sm:$0xf] %vm392_vm1, %v383_v12 }
  0xd3   : > { %v485_v13 = vpack.c.bf16 %v456_v9, %v456_v9  ;;  %1923 = vst.msk [vmem:[%s2412_s12 + $0x58] sm:$0xf] %vm392_vm1, %v691_v11  ;;  %v558_v14 = vpop.f32.mrf.mxu2 }
  0xd4   : > { %v559_v16 = vadd.f32 %v2401_v48, %v558_v14 }
  0xd5   : > { %501 = vst.msk [vmem:[%s2412_s12 + $0x1c] sm:$0xf] %vm392_vm1, %v485_v13  ;;  %v356_v18 = vpop.f32.mrf.mxu0 }
  0xd6   : > { %v662_v15 = vpop.f32.mrf.mxu3  ;;  %v357_v21 = vadd.f32 %v2381_v40, %v356_v18  ;;  %v588_v23 = vpack.c.bf16 %v559_v16, %v559_v16 }
  0xd7   : > { %v663_v17 = vadd.f32 %v2406_v49, %v662_v15 }
  0xd8   : > { %v458_v19 = vpop.f32.mrf.mxu1  ;;  %v384_v25 = vpack.c.bf16 %v357_v21, %v357_v21  ;;  %1950 = vmatmul.msk.bf16.gmra.mxu0 %vm302_vm0, %v2331_v30  ;;  %1887 = vst.msk [vmem:[%s2408_s17 + $0x5c] sm:$0xf] %vm392_vm1, %v588_v23  ;;  %2024 = vmatmul.msk.bf16.gmra.mxu2 %vm302_vm0, %v2331_v30 }
  0xd9   : > { %v459_v22 = vadd.f32 %v2386_v41, %v458_v19  ;;  %v692_v24 = vpack.c.bf16 %v663_v17, %v663_v17 }
  0xda   : > { %401 = vst.msk [vmem:[%s2408_s17 + $0x20] sm:$0xf] %vm392_vm1, %v384_v25 }
  0xdb   : > { %v486_v26 = vpack.c.bf16 %v459_v22, %v459_v22  ;;  %1987 = vmatmul.msk.bf16.gmra.mxu1 %vm302_vm0, %v2331_v30  ;;  %2061 = vmatmul.msk.bf16.gmra.mxu3 %vm302_vm0, %v2331_v30  ;;  %1924 = vst.msk [vmem:[%s2412_s12 + $0x5c] sm:$0xf] %vm392_vm1, %v692_v24  ;;  %v561_v28 = vpop.f32.mrf.mxu2 }
  0xdc   : > { %v562_v31 = vadd.f32 %v2401_v48, %v561_v28 }
  0xdd   : > { %502 = vst.msk [vmem:[%s2412_s12 + $0x20] sm:$0xf] %vm392_vm1, %v486_v26  ;;  %v358_v34 = vpop.f32.mrf.mxu0 }
  0xde   : > { %v665_v29 = vpop.f32.mrf.mxu3  ;;  %v359_v30 = vadd.f32 %v2381_v40, %v358_v34  ;;  %v589_v38 = vpack.c.bf16 %v562_v31, %v562_v31 }
  0xdf   : > { %v666_v32 = vadd.f32 %v2406_v49, %v665_v29 }
  0xe0   : > { %v460_v35 = vpop.f32.mrf.mxu1  ;;  %v385_v43 = vpack.c.bf16 %v359_v30, %v359_v30  ;;  %1888 = vst.msk [vmem:[%s2408_s17 + $0x60] sm:$0xf] %vm392_vm1, %v589_v38 }
  0xe1   : > { %v461_v37 = vadd.f32 %v2386_v41, %v460_v35  ;;  %v693_v42 = vpack.c.bf16 %v666_v32, %v666_v32 }
  0xe2   : > { %402 = vst.msk [vmem:[%s2408_s17 + $0x24] sm:$0xf] %vm392_vm1, %v385_v43 }
  0xe3   : > { %v487_v44 = vpack.c.bf16 %v461_v37, %v461_v37  ;;  %1925 = vst.msk [vmem:[%s2412_s12 + $0x60] sm:$0xf] %vm392_vm1, %v693_v42  ;;  %v563_v45 = vpop.f32.mrf.mxu2 }
  0xe4   : > { %v564_v47 = vadd.f32 %v2401_v48, %v563_v45 }
  0xe5   : > { %503 = vst.msk [vmem:[%s2412_s12 + $0x24] sm:$0xf] %vm392_vm1, %v487_v44  ;;  %v361_v50 = vpop.f32.mrf.mxu0 }
  0xe6   : > { %v667_v46 = vpop.f32.mrf.mxu3  ;;  %v362_v52 = vadd.f32 %v2381_v40, %v361_v50  ;;  %v590_v54 = vpack.c.bf16 %v564_v47, %v564_v47 }
  0xe7   : > { %v668_v20 = vadd.f32 %v2406_v49, %v667_v46 }
  0xe8   : > { %v463_v51 = vpop.f32.mrf.mxu1  ;;  %v386_v56 = vpack.c.bf16 %v362_v52, %v362_v52  ;;  %1951 = vmatmul.msk.bf16.gmra.mxu0 %vm302_vm0, %v2343_v33  ;;  %1889 = vst.msk [vmem:[%s2408_s17 + $0x64] sm:$0xf] %vm392_vm1, %v590_v54  ;;  %2025 = vmatmul.msk.bf16.gmra.mxu2 %vm302_vm0, %v2343_v33 }
  0xe9   : > { %v464_v53 = vadd.f32 %v2386_v41, %v463_v51  ;;  %v694_v55 = vpack.c.bf16 %v668_v20, %v668_v20 }
  0xea   : > { %403 = vst.msk [vmem:[%s2408_s17 + $0x28] sm:$0xf] %vm392_vm1, %v386_v56 }
  0xeb   : > { %v488_v57 = vpack.c.bf16 %v464_v53, %v464_v53  ;;  %1988 = vmatmul.msk.bf16.gmra.mxu1 %vm302_vm0, %v2343_v33  ;;  %2062 = vmatmul.msk.bf16.gmra.mxu3 %vm302_vm0, %v2343_v33  ;;  %1926 = vst.msk [vmem:[%s2412_s12 + $0x64] sm:$0xf] %vm392_vm1, %v694_v55  ;;  %v566_v58 = vpop.f32.mrf.mxu2 }
  0xec   : > { %v567_v60 = vadd.f32 %v2401_v48, %v566_v58  ;;  %v2651_v58 = vld [vmem:[%s3026_s2 + $0x2] ss:$0 sm:$0xff] }
  0xed   : > { %504 = vst.msk [vmem:[%s2412_s12 + $0x28] sm:$0xf] %vm392_vm1, %v488_v57  ;;  %v363_v62 = vpop.f32.mrf.mxu0 }
  0xee   : > { %v670_v59 = vpop.f32.mrf.mxu3  ;;  %v364_v33 = vadd.f32 %v2381_v40, %v363_v62  ;;  %v591_v1 = vpack.c.bf16 %v567_v60, %v567_v60 }
  0xef   : > { %v671_v61 = vadd.f32 %v2406_v49, %v670_v59 }
  0xf0   : > { %v465_v63 = vpop.f32.mrf.mxu1  ;;  %v387_v3 = vpack.c.bf16 %v364_v33, %v364_v33  ;;  %1890 = vst.msk [vmem:[%s2408_s17 + $0x68] sm:$0xf] %vm392_vm1, %v591_v1 }
  0xf1   : > { %v466_v0 = vadd.f32 %v2386_v41, %v465_v63  ;;  %v695_v2 = vpack.c.bf16 %v671_v61, %v671_v61 }
  0xf2   : > { %404 = vst.msk [vmem:[%s2408_s17 + $0x2c] sm:$0xf] %vm392_vm1, %v387_v3 }
  0xf3   : > { %v489_v4 = vpack.c.bf16 %v466_v0, %v466_v0  ;;  %1927 = vst.msk [vmem:[%s2412_s12 + $0x68] sm:$0xf] %vm392_vm1, %v695_v2  ;;  %v568_v5 = vpop.f32.mrf.mxu2 }
  0xf4   : > { %v569_v7 = vadd.f32 %v2401_v48, %v568_v5  ;;  %v2671_v5 = vld [vmem:[%s3026_s2 + $0x3] ss:$0 sm:$0xff] }
  0xf5   : > { %505 = vst.msk [vmem:[%s2412_s12 + $0x2c] sm:$0xf] %vm392_vm1, %v489_v4  ;;  %v366_v27 = vpop.f32.mrf.mxu0 }
  0xf6   : > { %v672_v6 = vpop.f32.mrf.mxu3  ;;  %v367_v10 = vadd.f32 %v2381_v40, %v366_v27  ;;  %v592_v12 = vpack.c.bf16 %v569_v7, %v569_v7 }
  0xf7   : > { %v673_v8 = vadd.f32 %v2406_v49, %v672_v6 }
  0xf8   : > { %v468_v9 = vpop.f32.mrf.mxu1  ;;  %v388_v14 = vpack.c.bf16 %v367_v10, %v367_v10  ;;  %1952 = vmatmul.msk.bf16.gmra.mxu0 %vm302_vm0, %v2355_v36  ;;  %1891 = vst.msk [vmem:[%s2408_s17 + $0x6c] sm:$0xf] %vm392_vm1, %v592_v12  ;;  %2026 = vmatmul.msk.bf16.gmra.mxu2 %vm302_vm0, %v2355_v36 }
  0xf9   : > { %v469_v11 = vadd.f32 %v2386_v41, %v468_v9  ;;  %v696_v13 = vpack.c.bf16 %v673_v8, %v673_v8 }
  0xfa   : > { %405 = vst.msk [vmem:[%s2408_s17 + $0x30] sm:$0xf] %vm392_vm1, %v388_v14 }
  0xfb   : > { %v490_v15 = vpack.c.bf16 %v469_v11, %v469_v11  ;;  %1989 = vmatmul.msk.bf16.gmra.mxu1 %vm302_vm0, %v2355_v36  ;;  %2063 = vmatmul.msk.bf16.gmra.mxu3 %vm302_vm0, %v2355_v36  ;;  %1928 = vst.msk [vmem:[%s2412_s12 + $0x6c] sm:$0xf] %vm392_vm1, %v696_v13  ;;  %v571_v16 = vpop.f32.mrf.mxu2 }
  0xfc   : > { %v572_v18 = vadd.f32 %v2401_v48, %v571_v16 }
  0xfd   : > { %506 = vst.msk [vmem:[%s2412_s12 + $0x30] sm:$0xf] %vm392_vm1, %v490_v15  ;;  %v368_v21 = vpop.f32.mrf.mxu0 }
  0xfe   : > { %v675_v17 = vpop.f32.mrf.mxu3  ;;  %v369_v36 = vadd.f32 %v2381_v40, %v368_v21  ;;  %v593_v24 = vpack.c.bf16 %v572_v18, %v572_v18 }
  0xff   : > { %v676_v19 = vadd.f32 %v2406_v49, %v675_v17 }
 0x100   : > { %v470_v22 = vpop.f32.mrf.mxu1  ;;  %v389_v26 = vpack.c.bf16 %v369_v36, %v369_v36  ;;  %1892 = vst.msk [vmem:[%s2408_s17 + $0x70] sm:$0xf] %vm392_vm1, %v593_v24 }
 0x101   : > { %v471_v23 = vadd.f32 %v2386_v41, %v470_v22  ;;  %v697_v25 = vpack.c.bf16 %v676_v19, %v676_v19 }
 0x102   : > { %406 = vst.msk [vmem:[%s2408_s17 + $0x34] sm:$0xf] %vm392_vm1, %v389_v26 }
 0x103   : > { %v491_v28 = vpack.c.bf16 %v471_v23, %v471_v23  ;;  %1929 = vst.msk [vmem:[%s2412_s12 + $0x70] sm:$0xf] %vm392_vm1, %v697_v25  ;;  %v573_v29 = vpop.f32.mrf.mxu2 }
 0x104   : > { %v574_v32 = vadd.f32 %v2401_v48, %v573_v29 }
 0x105   : > { %507 = vst.msk [vmem:[%s2412_s12 + $0x34] sm:$0xf] %vm392_vm1, %v491_v28  ;;  %v371_v35 = vpop.f32.mrf.mxu0 }
 0x106   : > { %v677_v31 = vpop.f32.mrf.mxu3  ;;  %v372_v37 = vadd.f32 %v2381_v40, %v371_v35  ;;  %v594_v42 = vpack.c.bf16 %v574_v32, %v574_v32 }
 0x107   : > { %v678_v34 = vadd.f32 %v2406_v49, %v677_v31 }
 0x108   : > { %v473_v30 = vpop.f32.mrf.mxu1  ;;  %v390_v44 = vpack.c.bf16 %v372_v37, %v372_v37  ;;  %1953 = vmatmul.msk.bf16.gmra.mxu0 %vm302_vm0, %v2367_v39  ;;  %1893 = vst.msk [vmem:[%s2408_s17 + $0x74] sm:$0xf] %vm392_vm1, %v594_v42  ;;  %2027 = vmatmul.msk.bf16.gmra.mxu2 %vm302_vm0, %v2367_v39 }
 0x109   : > { %v474_v38 = vadd.f32 %v2386_v41, %v473_v30  ;;  %v698_v43 = vpack.c.bf16 %v678_v34, %v678_v34 }
 0x10a   : > { %407 = vst.msk [vmem:[%s2408_s17 + $0x38] sm:$0xf] %vm392_vm1, %v390_v44 }
 0x10b   : > { %v492_v45 = vpack.c.bf16 %v474_v38, %v474_v38  ;;  %1990 = vmatmul.msk.bf16.gmra.mxu1 %vm302_vm0, %v2367_v39  ;;  %2064 = vmatmul.msk.bf16.gmra.mxu3 %vm302_vm0, %v2367_v39  ;;  %1930 = vst.msk [vmem:[%s2412_s12 + $0x74] sm:$0xf] %vm392_vm1, %v698_v43  ;;  %v576_v46 = vpop.f32.mrf.mxu2 }
 0x10c   : > { %v577_v20 = vadd.f32 %v2401_v48, %v576_v46 }
 0x10d   : > { %508 = vst.msk [vmem:[%s2412_s12 + $0x38] sm:$0xf] %vm392_vm1, %v492_v45  ;;  %v373_v51 = vpop.f32.mrf.mxu0 }
 0x10e   : > { %v680_v47 = vpop.f32.mrf.mxu3  ;;  %v374_v39 = vadd.f32 %v2381_v40, %v373_v51  ;;  %v595_v54 = vpack.c.bf16 %v577_v20, %v577_v20  ;;  %v2656_v40 = vld [vmem:[%s3028_s4 + $0x2] ss:$0 sm:$0xff] }
 0x10f   : > { %v681_v50 = vadd.f32 %v2406_v49, %v680_v47 }
 0x110   : > { %v475_v52 = vpop.f32.mrf.mxu1  ;;  %v391_v56 = vpack.c.bf16 %v374_v39, %v374_v39  ;;  %1894 = vst.msk [vmem:[%s2408_s17 + $0x78] sm:$0xf] %vm392_vm1, %v595_v54 }
 0x111   : > { %v476_v53 = vadd.f32 %v2386_v41, %v475_v52  ;;  %v699_v55 = vpack.c.bf16 %v681_v50, %v681_v50 }
 0x112   : > { %408 = vst.msk [vmem:[%s2408_s17 + $0x3c] sm:$0xf] %vm392_vm1, %v391_v56 }
 0x113   : > { %v493_v57 = vpack.c.bf16 %v476_v53, %v476_v53  ;;  %1931 = vst.msk [vmem:[%s2412_s12 + $0x78] sm:$0xf] %vm392_vm1, %v699_v55  ;;  %v578_v41 = vpop.f32.mrf.mxu2 }
 0x114   : > { %v579_v60 = vadd.f32 %v2401_v48, %v578_v41  ;;  %v2676_v48 = vld [vmem:[%s3028_s4 + $0x3] ss:$0 sm:$0xff] }
 0x115   : > { %509 = vst.msk [vmem:[%s2412_s12 + $0x3c] sm:$0xf] %vm392_vm1, %v493_v57  ;;  %v749_v62 = vpop.f32.mrf.mxu0 }
 0x116   : > { %v682_v59 = vpop.f32.mrf.mxu3  ;;  %v750_v33 = vadd.f32 %v2651_v58, %v749_v62  ;;  %v596_v1 = vpack.c.bf16 %v579_v60, %v579_v60 }
 0x117   : > { %v683_v61 = vadd.f32 %v2406_v49, %v682_v59 }
 0x118   : > { %v853_v63 = vpop.f32.mrf.mxu1  ;;  %v789_v3 = vpack.c.bf16 %v750_v33, %v750_v33  ;;  %1895 = vst.msk [vmem:[%s2408_s17 + $0x7c] sm:$0xf] %vm392_vm1, %v596_v1 }
 0x119   : > { %v854_v0 = vadd.f32 %v2656_v40, %v853_v63  ;;  %v700_v2 = vpack.c.bf16 %v683_v61, %v683_v61 }
 0x11a   : > { %1954 = vst.msk [vmem:[%s2408_s17 + $0x80] sm:$0xf] %vm392_vm1, %v789_v3 }
 0x11b   : > { %v893_v4 = vpack.c.bf16 %v854_v0, %v854_v0  ;;  %1932 = vst.msk [vmem:[%s2412_s12 + $0x7c] sm:$0xf] %vm392_vm1, %v700_v2  ;;  %v957_v49 = vpop.f32.mrf.mxu2 }
 0x11c   : > { %v958_v7 = vadd.f32 %v2671_v5, %v957_v49 }
 0x11d   : > { %1991 = vst.msk [vmem:[%s2412_s12 + $0x80] sm:$0xf] %vm392_vm1, %v893_v4  ;;  %v751_v27 = vpop.f32.mrf.mxu0 }
 0x11e   : > { %v1061_v6 = vpop.f32.mrf.mxu3  ;;  %v752_v10 = vadd.f32 %v2651_v58, %v751_v27  ;;  %v997_v12 = vpack.c.bf16 %v958_v7, %v958_v7 }
 0x11f   : > { %v1062_v8 = vadd.f32 %v2676_v48, %v1061_v6 }
 0x120   : > { %v855_v9 = vpop.f32.mrf.mxu1  ;;  %v790_v14 = vpack.c.bf16 %v752_v10, %v752_v10  ;;  %2028 = vst.msk [vmem:[%s2408_s17 + $0xc0] sm:$0xf] %vm392_vm1, %v997_v12 }
 0x121   : > { %v856_v11 = vadd.f32 %v2656_v40, %v855_v9  ;;  %v1101_v13 = vpack.c.bf16 %v1062_v8, %v1062_v8 }
 0x122   : > { %1955 = vst.msk [vmem:[%s2408_s17 + $0x84] sm:$0xf] %vm392_vm1, %v790_v14 }
 0x123   : > { %v894_v15 = vpack.c.bf16 %v856_v11, %v856_v11  ;;  %2065 = vst.msk [vmem:[%s2412_s12 + $0xc0] sm:$0xf] %vm392_vm1, %v1101_v13  ;;  %v959_v16 = vpop.f32.mrf.mxu2 }
 0x124   : > { %v960_v18 = vadd.f32 %v2671_v5, %v959_v16 }
 0x125   : > { %1992 = vst.msk [vmem:[%s2412_s12 + $0x84] sm:$0xf] %vm392_vm1, %v894_v15  ;;  %v754_v21 = vpop.f32.mrf.mxu0 }
 0x126   : > { %v1063_v17 = vpop.f32.mrf.mxu3  ;;  %v755_v36 = vadd.f32 %v2651_v58, %v754_v21  ;;  %v998_v24 = vpack.c.bf16 %v960_v18, %v960_v18 }
 0x127   : > { %v1064_v19 = vadd.f32 %v2676_v48, %v1063_v17 }
 0x128   : > { %v858_v22 = vpop.f32.mrf.mxu1  ;;  %v791_v26 = vpack.c.bf16 %v755_v36, %v755_v36  ;;  %2029 = vst.msk [vmem:[%s2408_s17 + $0xc4] sm:$0xf] %vm392_vm1, %v998_v24 }
 0x129   : > { %v859_v23 = vadd.f32 %v2656_v40, %v858_v22  ;;  %v1102_v25 = vpack.c.bf16 %v1064_v19, %v1064_v19 }
 0x12a   : > { %1956 = vst.msk [vmem:[%s2408_s17 + $0x88] sm:$0xf] %vm392_vm1, %v791_v26 }
 0x12b   : > { %v895_v28 = vpack.c.bf16 %v859_v23, %v859_v23  ;;  %2066 = vst.msk [vmem:[%s2412_s12 + $0xc4] sm:$0xf] %vm392_vm1, %v1102_v25  ;;  %v962_v29 = vpop.f32.mrf.mxu2 }
 0x12c   : > { %v963_v32 = vadd.f32 %v2671_v5, %v962_v29 }
 0x12d   : > { %1993 = vst.msk [vmem:[%s2412_s12 + $0x88] sm:$0xf] %vm392_vm1, %v895_v28  ;;  %v756_v35 = vpop.f32.mrf.mxu0 }
 0x12e   : > { %v1066_v31 = vpop.f32.mrf.mxu3  ;;  %v757_v37 = vadd.f32 %v2651_v58, %v756_v35  ;;  %v999_v42 = vpack.c.bf16 %v963_v32, %v963_v32 }
 0x12f   : > { %v1067_v34 = vadd.f32 %v2676_v48, %v1066_v31 }
 0x130   : > { %v860_v30 = vpop.f32.mrf.mxu1  ;;  %v792_v44 = vpack.c.bf16 %v757_v37, %v757_v37  ;;  %2030 = vst.msk [vmem:[%s2408_s17 + $0xc8] sm:$0xf] %vm392_vm1, %v999_v42 }
 0x131   : > { %v861_v38 = vadd.f32 %v2656_v40, %v860_v30  ;;  %v1103_v43 = vpack.c.bf16 %v1067_v34, %v1067_v34 }
 0x132   : > { %1957 = vst.msk [vmem:[%s2408_s17 + $0x8c] sm:$0xf] %vm392_vm1, %v792_v44 }
 0x133   : > { %v896_v45 = vpack.c.bf16 %v861_v38, %v861_v38  ;;  %2067 = vst.msk [vmem:[%s2412_s12 + $0xc8] sm:$0xf] %vm392_vm1, %v1103_v43  ;;  %v964_v46 = vpop.f32.mrf.mxu2 }
 0x134   : > { %v965_v20 = vadd.f32 %v2671_v5, %v964_v46 }
 0x135   : > { %1994 = vst.msk [vmem:[%s2412_s12 + $0x8c] sm:$0xf] %vm392_vm1, %v896_v45  ;;  %v759_v51 = vpop.f32.mrf.mxu0 }
 0x136   : > { %v1068_v47 = vpop.f32.mrf.mxu3  ;;  %v760_v39 = vadd.f32 %v2651_v58, %v759_v51  ;;  %v1000_v54 = vpack.c.bf16 %v965_v20, %v965_v20 }
 0x137   : > { %v1069_v50 = vadd.f32 %v2676_v48, %v1068_v47 }
 0x138   : > { %v863_v52 = vpop.f32.mrf.mxu1  ;;  %v793_v56 = vpack.c.bf16 %v760_v39, %v760_v39  ;;  %2031 = vst.msk [vmem:[%s2408_s17 + $0xcc] sm:$0xf] %vm392_vm1, %v1000_v54 }
 0x139   : > { %v864_v53 = vadd.f32 %v2656_v40, %v863_v52  ;;  %v1104_v55 = vpack.c.bf16 %v1069_v50, %v1069_v50 }
 0x13a   : > { %1958 = vst.msk [vmem:[%s2408_s17 + $0x90] sm:$0xf] %vm392_vm1, %v793_v56 }
 0x13b   : > { %v897_v57 = vpack.c.bf16 %v864_v53, %v864_v53  ;;  %2068 = vst.msk [vmem:[%s2412_s12 + $0xcc] sm:$0xf] %vm392_vm1, %v1104_v55  ;;  %v967_v41 = vpop.f32.mrf.mxu2 }
 0x13c   : > { %v968_v60 = vadd.f32 %v2671_v5, %v967_v41 }
 0x13d   : > { %1995 = vst.msk [vmem:[%s2412_s12 + $0x90] sm:$0xf] %vm392_vm1, %v897_v57  ;;  %v761_v62 = vpop.f32.mrf.mxu0 }
 0x13e   : > { %v1071_v59 = vpop.f32.mrf.mxu3  ;;  %v762_v33 = vadd.f32 %v2651_v58, %v761_v62  ;;  %v1001_v1 = vpack.c.bf16 %v968_v60, %v968_v60 }
 0x13f   : > { %v1072_v61 = vadd.f32 %v2676_v48, %v1071_v59 }
 0x140   : > { %v865_v63 = vpop.f32.mrf.mxu1  ;;  %v794_v3 = vpack.c.bf16 %v762_v33, %v762_v33  ;;  %2032 = vst.msk [vmem:[%s2408_s17 + $0xd0] sm:$0xf] %vm392_vm1, %v1001_v1 }
 0x141   : > { %v866_v0 = vadd.f32 %v2656_v40, %v865_v63  ;;  %v1105_v2 = vpack.c.bf16 %v1072_v61, %v1072_v61 }
 0x142   : > { %1959 = vst.msk [vmem:[%s2408_s17 + $0x94] sm:$0xf] %vm392_vm1, %v794_v3 }
 0x143   : > { %v898_v4 = vpack.c.bf16 %v866_v0, %v866_v0  ;;  %2069 = vst.msk [vmem:[%s2412_s12 + $0xd0] sm:$0xf] %vm392_vm1, %v1105_v2  ;;  %v969_v49 = vpop.f32.mrf.mxu2 }
 0x144   : > { %v970_v7 = vadd.f32 %v2671_v5, %v969_v49 }
 0x145   : > { %1996 = vst.msk [vmem:[%s2412_s12 + $0x94] sm:$0xf] %vm392_vm1, %v898_v4  ;;  %v764_v27 = vpop.f32.mrf.mxu0 }
 0x146   : > { %v1073_v6 = vpop.f32.mrf.mxu3  ;;  %v765_v10 = vadd.f32 %v2651_v58, %v764_v27  ;;  %v1002_v12 = vpack.c.bf16 %v970_v7, %v970_v7 }
 0x147   : > { %v1074_v8 = vadd.f32 %v2676_v48, %v1073_v6 }
 0x148   : > { %v868_v9 = vpop.f32.mrf.mxu1  ;;  %v795_v14 = vpack.c.bf16 %v765_v10, %v765_v10  ;;  %2033 = vst.msk [vmem:[%s2408_s17 + $0xd4] sm:$0xf] %vm392_vm1, %v1002_v12 }
 0x149   : > { %v869_v11 = vadd.f32 %v2656_v40, %v868_v9  ;;  %v1106_v13 = vpack.c.bf16 %v1074_v8, %v1074_v8 }
 0x14a   : > { %1960 = vst.msk [vmem:[%s2408_s17 + $0x98] sm:$0xf] %vm392_vm1, %v795_v14 }
 0x14b   : > { %v899_v15 = vpack.c.bf16 %v869_v11, %v869_v11  ;;  %2070 = vst.msk [vmem:[%s2412_s12 + $0xd4] sm:$0xf] %vm392_vm1, %v1106_v13  ;;  %v972_v16 = vpop.f32.mrf.mxu2 }
 0x14c   : > { %v973_v18 = vadd.f32 %v2671_v5, %v972_v16 }
 0x14d   : > { %1997 = vst.msk [vmem:[%s2412_s12 + $0x98] sm:$0xf] %vm392_vm1, %v899_v15  ;;  %v766_v21 = vpop.f32.mrf.mxu0 }
 0x14e   : > { %v1076_v17 = vpop.f32.mrf.mxu3  ;;  %v767_v36 = vadd.f32 %v2651_v58, %v766_v21  ;;  %v1003_v24 = vpack.c.bf16 %v973_v18, %v973_v18 }
 0x14f   : > { %v1077_v19 = vadd.f32 %v2676_v48, %v1076_v17 }
 0x150   : > { %v870_v22 = vpop.f32.mrf.mxu1  ;;  %v796_v26 = vpack.c.bf16 %v767_v36, %v767_v36  ;;  %2034 = vst.msk [vmem:[%s2408_s17 + $0xd8] sm:$0xf] %vm392_vm1, %v1003_v24 }
 0x151   : > { %v871_v23 = vadd.f32 %v2656_v40, %v870_v22  ;;  %v1107_v25 = vpack.c.bf16 %v1077_v19, %v1077_v19 }
 0x152   : > { %1961 = vst.msk [vmem:[%s2408_s17 + $0x9c] sm:$0xf] %vm392_vm1, %v796_v26 }
 0x153   : > { %v900_v28 = vpack.c.bf16 %v871_v23, %v871_v23  ;;  %2071 = vst.msk [vmem:[%s2412_s12 + $0xd8] sm:$0xf] %vm392_vm1, %v1107_v25  ;;  %v974_v29 = vpop.f32.mrf.mxu2 }
 0x154   : > { %v975_v32 = vadd.f32 %v2671_v5, %v974_v29 }
 0x155   : > { %1998 = vst.msk [vmem:[%s2412_s12 + $0x9c] sm:$0xf] %vm392_vm1, %v900_v28  ;;  %v769_v35 = vpop.f32.mrf.mxu0 }
 0x156   : > { %v1078_v31 = vpop.f32.mrf.mxu3  ;;  %v770_v37 = vadd.f32 %v2651_v58, %v769_v35  ;;  %v1004_v42 = vpack.c.bf16 %v975_v32, %v975_v32 }
 0x157   : > { %v1079_v34 = vadd.f32 %v2676_v48, %v1078_v31 }
 0x158   : > { %v873_v30 = vpop.f32.mrf.mxu1  ;;  %v797_v44 = vpack.c.bf16 %v770_v37, %v770_v37  ;;  %2035 = vst.msk [vmem:[%s2408_s17 + $0xdc] sm:$0xf] %vm392_vm1, %v1004_v42 }
 0x159   : > { %v874_v38 = vadd.f32 %v2656_v40, %v873_v30  ;;  %v1108_v43 = vpack.c.bf16 %v1079_v34, %v1079_v34 }
 0x15a   : > { %1962 = vst.msk [vmem:[%s2408_s17 + $0xa0] sm:$0xf] %vm392_vm1, %v797_v44 }
 0x15b   : > { %v901_v45 = vpack.c.bf16 %v874_v38, %v874_v38  ;;  %2072 = vst.msk [vmem:[%s2412_s12 + $0xdc] sm:$0xf] %vm392_vm1, %v1108_v43  ;;  %v977_v46 = vpop.f32.mrf.mxu2 }
 0x15c   : > { %v978_v20 = vadd.f32 %v2671_v5, %v977_v46 }
 0x15d   : > { %1999 = vst.msk [vmem:[%s2412_s12 + $0xa0] sm:$0xf] %vm392_vm1, %v901_v45  ;;  %v771_v51 = vpop.f32.mrf.mxu0 }
 0x15e   : > { %v1081_v47 = vpop.f32.mrf.mxu3  ;;  %v772_v39 = vadd.f32 %v2651_v58, %v771_v51  ;;  %v1005_v54 = vpack.c.bf16 %v978_v20, %v978_v20 }
 0x15f   : > { %v1082_v50 = vadd.f32 %v2676_v48, %v1081_v47 }
 0x160   : > { %v875_v52 = vpop.f32.mrf.mxu1  ;;  %v798_v56 = vpack.c.bf16 %v772_v39, %v772_v39  ;;  %2036 = vst.msk [vmem:[%s2408_s17 + $0xe0] sm:$0xf] %vm392_vm1, %v1005_v54 }
 0x161   : > { %v876_v53 = vadd.f32 %v2656_v40, %v875_v52  ;;  %v1109_v55 = vpack.c.bf16 %v1082_v50, %v1082_v50 }
 0x162   : > { %1963 = vst.msk [vmem:[%s2408_s17 + $0xa4] sm:$0xf] %vm392_vm1, %v798_v56 }
 0x163   : > { %v902_v57 = vpack.c.bf16 %v876_v53, %v876_v53  ;;  %2073 = vst.msk [vmem:[%s2412_s12 + $0xe0] sm:$0xf] %vm392_vm1, %v1109_v55  ;;  %v979_v41 = vpop.f32.mrf.mxu2 }
 0x164   : > { %v980_v60 = vadd.f32 %v2671_v5, %v979_v41 }
 0x165   : > { %2000 = vst.msk [vmem:[%s2412_s12 + $0xa4] sm:$0xf] %vm392_vm1, %v902_v57  ;;  %v774_v62 = vpop.f32.mrf.mxu0 }
 0x166   : > { %v1083_v59 = vpop.f32.mrf.mxu3  ;;  %v775_v33 = vadd.f32 %v2651_v58, %v774_v62  ;;  %v1006_v1 = vpack.c.bf16 %v980_v60, %v980_v60 }
 0x167   : > { %v1084_v61 = vadd.f32 %v2676_v48, %v1083_v59 }
 0x168   : > { %v878_v63 = vpop.f32.mrf.mxu1  ;;  %v799_v3 = vpack.c.bf16 %v775_v33, %v775_v33  ;;  %2037 = vst.msk [vmem:[%s2408_s17 + $0xe4] sm:$0xf] %vm392_vm1, %v1006_v1 }
 0x169   : > { %v879_v0 = vadd.f32 %v2656_v40, %v878_v63  ;;  %v1110_v2 = vpack.c.bf16 %v1084_v61, %v1084_v61 }
 0x16a   : > { %1964 = vst.msk [vmem:[%s2408_s17 + $0xa8] sm:$0xf] %vm392_vm1, %v799_v3 }
 0x16b   : > { %v903_v4 = vpack.c.bf16 %v879_v0, %v879_v0  ;;  %2074 = vst.msk [vmem:[%s2412_s12 + $0xe4] sm:$0xf] %vm392_vm1, %v1110_v2  ;;  %v982_v49 = vpop.f32.mrf.mxu2 }
 0x16c   : > { %v983_v7 = vadd.f32 %v2671_v5, %v982_v49 }
 0x16d   : > { %2001 = vst.msk [vmem:[%s2412_s12 + $0xa8] sm:$0xf] %vm392_vm1, %v903_v4  ;;  %v776_v27 = vpop.f32.mrf.mxu0 }
 0x16e   : > { %v1086_v6 = vpop.f32.mrf.mxu3  ;;  %v777_v10 = vadd.f32 %v2651_v58, %v776_v27  ;;  %v1007_v12 = vpack.c.bf16 %v983_v7, %v983_v7  ;;  %v1172_v27 = vld [vmem:[%s2408_s17 + $0x10] sm:$0xff] (%p2223_p4)  }
 0x16f   : > { %v1087_v8 = vadd.f32 %v2676_v48, %v1086_v6  ;;  %1173 = vst [vmem:[%s2878_s11 + $0x10] sm:$0xff] (%p2223_p4), %v1172_v27  }
 0x170   : > { %v880_v9 = vpop.f32.mrf.mxu1  ;;  %v800_v14 = vpack.c.bf16 %v777_v10, %v777_v10  ;;  %2038 = vst.msk [vmem:[%s2408_s17 + $0xe8] sm:$0xf] %vm392_vm1, %v1007_v12  ;;  %v1180_v10 = vld [vmem:[%s2408_s17 + $0x20] sm:$0xff] (%p2223_p4)   ;;  %v1188_v12 = vld [vmem:[%s2408_s17 + $0x30] sm:$0xff] (%p2223_p4)  }
 0x171   : > { %v881_v11 = vadd.f32 %v2656_v40, %v880_v9  ;;  %v1111_v13 = vpack.c.bf16 %v1087_v8, %v1087_v8  ;;  %v1176_v9 = vld [vmem:[%s2408_s17 + $0x18] sm:$0xff] (%p2223_p4)   ;;  %1181 = vst [vmem:[%s2878_s11 + $0x20] sm:$0xff] (%p2223_p4), %v1180_v10  }
 0x172   : > { %1965 = vst.msk [vmem:[%s2408_s17 + $0xac] sm:$0xf] %vm392_vm1, %v800_v14  ;;  %v1196_v14 = vld [vmem:[%s2408_s17 + $0x40] sm:$0xff] (%p2223_p4)  }
 0x173   : > { %v904_v15 = vpack.c.bf16 %v881_v11, %v881_v11  ;;  %2075 = vst.msk [vmem:[%s2412_s12 + $0xe8] sm:$0xf] %vm392_vm1, %v1111_v13  ;;  %v984_v16 = vpop.f32.mrf.mxu2  ;;  %v1184_v11 = vld [vmem:[%s2408_s17 + $0x28] sm:$0xff] (%p2223_p4)   ;;  %v1192_v13 = vld [vmem:[%s2408_s17 + $0x38] sm:$0xff] (%p2223_p4)  }
 0x174   : > { %v985_v18 = vadd.f32 %v2671_v5, %v984_v16  ;;  %1177 = vst [vmem:[%s2878_s11 + $0x18] sm:$0xff] (%p2223_p4), %v1176_v9   ;;  %v1204_v16 = vld [vmem:[%s2408_s17 + $0x50] sm:$0xff] (%p2223_p4)  }
 0x175   : > { %2002 = vst.msk [vmem:[%s2412_s12 + $0xac] sm:$0xf] %vm392_vm1, %v904_v15  ;;  %v779_v21 = vpop.f32.mrf.mxu0  ;;  %v1200_v15 = vld [vmem:[%s2408_s17 + $0x48] sm:$0xff] (%p2223_p4)  }
 0x176   : > { %v1088_v17 = vpop.f32.mrf.mxu3  ;;  %v780_v36 = vadd.f32 %v2651_v58, %v779_v21  ;;  %v1008_v24 = vpack.c.bf16 %v985_v18, %v985_v18  ;;  %1185 = vst [vmem:[%s2878_s11 + $0x28] sm:$0xff] (%p2223_p4), %v1184_v11   ;;  %v1212_v18 = vld [vmem:[%s2408_s17 + $0x60] sm:$0xff] (%p2223_p4)   ;;  %v1220_v21 = vld [vmem:[%s2408_s17 + $0x70] sm:$0xff] (%p2223_p4)  }
 0x177   : > { %v1089_v19 = vadd.f32 %v2676_v48, %v1088_v17  ;;  %1189 = vst [vmem:[%s2878_s11 + $0x30] sm:$0xff] (%p2223_p4), %v1188_v12   ;;  %v1208_v17 = vld [vmem:[%s2408_s17 + $0x58] sm:$0xff] (%p2223_p4)  }
 0x178   : > { %v883_v22 = vpop.f32.mrf.mxu1  ;;  %v801_v26 = vpack.c.bf16 %v780_v36, %v780_v36  ;;  %2039 = vst.msk [vmem:[%s2408_s17 + $0xec] sm:$0xf] %vm392_vm1, %v1008_v24  ;;  %v1228_v36 = vld [vmem:[%s2408_s17 + $0x80] sm:$0xff] (%p2223_p4)   ;;  %v1236_v24 = vld [vmem:[%s2408_s17 + $0x90] sm:$0xff] (%p2223_p4)  }
 0x179   : > { %v884_v23 = vadd.f32 %v2656_v40, %v883_v22  ;;  %v1112_v25 = vpack.c.bf16 %v1089_v19, %v1089_v19  ;;  %1193 = vst [vmem:[%s2878_s11 + $0x38] sm:$0xff] (%p2223_p4), %v1192_v13   ;;  %v1216_v19 = vld [vmem:[%s2408_s17 + $0x68] sm:$0xff] (%p2223_p4)   ;;  %v1224_v22 = vld [vmem:[%s2408_s17 + $0x78] sm:$0xff] (%p2223_p4)  }
 0x17a   : > { %1966 = vst.msk [vmem:[%s2408_s17 + $0xb0] sm:$0xf] %vm392_vm1, %v801_v26  ;;  %v1244_v26 = vld [vmem:[%s2408_s17 + $0xa0] sm:$0xff] (%p2223_p4)  }
 0x17b   : > { %v905_v28 = vpack.c.bf16 %v884_v23, %v884_v23  ;;  %2076 = vst.msk [vmem:[%s2412_s12 + $0xec] sm:$0xf] %vm392_vm1, %v1112_v25  ;;  %v987_v29 = vpop.f32.mrf.mxu2  ;;  %v1232_v23 = vld [vmem:[%s2408_s17 + $0x88] sm:$0xff] (%p2223_p4)   ;;  %v1240_v25 = vld [vmem:[%s2408_s17 + $0x98] sm:$0xff] (%p2223_p4)  }
 0x17c   : > { %v988_v32 = vadd.f32 %v2671_v5, %v987_v29  ;;  %1197 = vst [vmem:[%s2878_s11 + $0xc0] sm:$0xff] (%p2223_p4), %v1196_v14  }
 0x17d   : > { %2003 = vst.msk [vmem:[%s2412_s12 + $0xb0] sm:$0xf] %vm392_vm1, %v905_v28  ;;  %v781_v35 = vpop.f32.mrf.mxu0  ;;  %v1248_v28 = vld [vmem:[%s2408_s17 + $0xa8] sm:$0xff] (%p2223_p4)  }
 0x17e   : > { %v1091_v31 = vpop.f32.mrf.mxu3  ;;  %v782_v37 = vadd.f32 %v2651_v58, %v781_v35  ;;  %v1009_v42 = vpack.c.bf16 %v988_v32, %v988_v32  ;;  %1201 = vst [vmem:[%s2878_s11 + $0xc8] sm:$0xff] (%p2223_p4), %v1200_v15   ;;  %v1260_v32 = vld [vmem:[%s2408_s17 + $0xc0] sm:$0xff] (%p2223_p4)   ;;  %v1268_v35 = vld [vmem:[%s2408_s17 + $0xd0] sm:$0xff] (%p2223_p4)  }
 0x17f   : > { %v1092_v34 = vadd.f32 %v2676_v48, %v1091_v31  ;;  %1205 = vst [vmem:[%s2878_s11 + $0xd0] sm:$0xff] (%p2223_p4), %v1204_v16  }
 0x180   : > { %v885_v30 = vpop.f32.mrf.mxu1  ;;  %v802_v44 = vpack.c.bf16 %v782_v37, %v782_v37  ;;  %2040 = vst.msk [vmem:[%s2408_s17 + $0xf0] sm:$0xf] %vm392_vm1, %v1009_v42  ;;  %v1276_v37 = vld [vmem:[%s2408_s17 + $0xe0] sm:$0xff] (%p2223_p4)  }
 0x181   : > { %v886_v38 = vadd.f32 %v2656_v40, %v885_v30  ;;  %v1113_v43 = vpack.c.bf16 %v1092_v34, %v1092_v34  ;;  %1209 = vst [vmem:[%s2878_s11 + $0xd8] sm:$0xff] (%p2223_p4), %v1208_v17   ;;  %v1264_v34 = vld [vmem:[%s2408_s17 + $0xc8] sm:$0xff] (%p2223_p4)   ;;  %v1272_v30 = vld [vmem:[%s2408_s17 + $0xd8] sm:$0xff] (%p2223_p4)  }
 0x182   : > { %1967 = vst.msk [vmem:[%s2408_s17 + $0xb4] sm:$0xf] %vm392_vm1, %v802_v44 }
 0x183   : > { %v906_v45 = vpack.c.bf16 %v886_v38, %v886_v38  ;;  %2077 = vst.msk [vmem:[%s2412_s12 + $0xf0] sm:$0xf] %vm392_vm1, %v1113_v43  ;;  %v989_v46 = vpop.f32.mrf.mxu2  ;;  %v1280_v38 = vld [vmem:[%s2408_s17 + $0xe8] sm:$0xff] (%p2223_p4)  }
 0x184   : > { %v990_v20 = vadd.f32 %v2671_v5, %v989_v46  ;;  %1213 = vst [vmem:[%s2878_s11 + $0xe0] sm:$0xff] (%p2223_p4), %v1212_v18  }
 0x185   : > { %2004 = vst.msk [vmem:[%s2412_s12 + $0xb4] sm:$0xf] %vm392_vm1, %v906_v45  ;;  %v784_v51 = vpop.f32.mrf.mxu0 }
 0x186   : > { %v1093_v47 = vpop.f32.mrf.mxu3  ;;  %v785_v39 = vadd.f32 %v2651_v58, %v784_v51  ;;  %v1010_v54 = vpack.c.bf16 %v990_v20, %v990_v20  ;;  %1217 = vst [vmem:[%s2878_s11 + $0xe8] sm:$0xff] (%p2223_p4), %v1216_v19  }
 0x187   : > { %v1094_v50 = vadd.f32 %v2676_v48, %v1093_v47  ;;  %1221 = vst [vmem:[%s2878_s11 + $0xf0] sm:$0xff] (%p2223_p4), %v1220_v21  }
 0x188   : > { %v888_v52 = vpop.f32.mrf.mxu1  ;;  %v803_v56 = vpack.c.bf16 %v785_v39, %v785_v39  ;;  %2041 = vst.msk [vmem:[%s2408_s17 + $0xf4] sm:$0xf] %vm392_vm1, %v1010_v54 }
 0x189   : > { %v889_v53 = vadd.f32 %v2656_v40, %v888_v52  ;;  %v1114_v55 = vpack.c.bf16 %v1094_v50, %v1094_v50  ;;  %1225 = vst [vmem:[%s2878_s11 + $0xf8] sm:$0xff] (%p2223_p4), %v1224_v22   ;;  %v1252_v29 = vld [vmem:[%s2408_s17 + $0xb0] sm:$0xff] (%p2223_p4)  }
 0x18a   : > { %1968 = vst.msk [vmem:[%s2408_s17 + $0xb8] sm:$0xf] %vm392_vm1, %v803_v56 }
 0x18b   : > { %v907_v57 = vpack.c.bf16 %v889_v53, %v889_v53  ;;  %2078 = vst.msk [vmem:[%s2412_s12 + $0xf4] sm:$0xf] %vm392_vm1, %v1114_v55  ;;  %v992_v41 = vpop.f32.mrf.mxu2 }
 0x18c   : > { %v993_v60 = vadd.f32 %v2671_v5, %v992_v41  ;;  %1229 = vst [vmem:[%s2878_s11 + $0x180] sm:$0xff] (%p2223_p4), %v1228_v36  }
 0x18d   : > { %2005 = vst.msk [vmem:[%s2412_s12 + $0xb8] sm:$0xf] %vm392_vm1, %v907_v57  ;;  %v786_v62 = vpop.f32.mrf.mxu0 }
 0x18e   : > { %v1096_v59 = vpop.f32.mrf.mxu3  ;;  %v787_v33 = vadd.f32 %v2651_v58, %v786_v62  ;;  %v1011_v1 = vpack.c.bf16 %v993_v60, %v993_v60  ;;  %1233 = vst [vmem:[%s2878_s11 + $0x188] sm:$0xff] (%p2223_p4), %v1232_v23  }
 0x18f   : > { %v1097_v61 = vadd.f32 %v2676_v48, %v1096_v59  ;;  %1237 = vst [vmem:[%s2878_s11 + $0x190] sm:$0xff] (%p2223_p4), %v1236_v24   ;;  %v1284_v42 = vld [vmem:[%s2408_s17 + $0xf0] sm:$0xff] (%p2223_p4)  }
 0x190   : > { %v890_v63 = vpop.f32.mrf.mxu1  ;;  %v804_v3 = vpack.c.bf16 %v787_v33, %v787_v33  ;;  %2042 = vst.msk [vmem:[%s2408_s17 + $0xf8] sm:$0xf] %vm392_vm1, %v1011_v1 }
 0x191   : > { %v891_v0 = vadd.f32 %v2656_v40, %v890_v63  ;;  %v1115_v2 = vpack.c.bf16 %v1097_v61, %v1097_v61  ;;  %1241 = vst [vmem:[%s2878_s11 + $0x198] sm:$0xff] (%p2223_p4), %v1240_v25  }
 0x192   : > { %1969 = vst.msk [vmem:[%s2408_s17 + $0xbc] sm:$0xf] %vm392_vm1, %v804_v3 }
 0x193   : > { %v908_v4 = vpack.c.bf16 %v891_v0, %v891_v0  ;;  %2079 = vst.msk [vmem:[%s2412_s12 + $0xf8] sm:$0xf] %vm392_vm1, %v1115_v2  ;;  %v994_v49 = vpop.f32.mrf.mxu2 }
 0x194   : > { %v995_v58 = vadd.f32 %v2671_v5, %v994_v49  ;;  %v1164_v5 = vld [vmem:[%s2408_s17] sm:$0xff] (%p2223_p4)   ;;  %1245 = vst [vmem:[%s2878_s11 + $0x1a0] sm:$0xff] (%p2223_p4), %v1244_v26  }
 0x195   : > { %2006 = vst.msk [vmem:[%s2412_s12 + $0xbc] sm:$0xf] %vm392_vm1, %v908_v4 }
 0x196   : > { %v1098_v6 = vpop.f32.mrf.mxu3  ;;  %v1012_v40 = vpack.c.bf16 %v995_v58, %v995_v58  ;;  %1165 = vst [vmem:[%s2878_s11] sm:$0xff] (%p2223_p4), %v1164_v5  }
 0x197   : > { %v1099_v7 = vadd.f32 %v2676_v48, %v1098_v6  ;;  %1144 = sbr.rel (!%p2223_p4) target bundleno = 421 (0x1a5), region = 44  ;;  %v1168_v48 = vld [vmem:[%s2408_s17 + $0x8] sm:$0xff] (%p2223_p4)   ;;  %1249 = vst [vmem:[%s2878_s11 + $0x1a8] sm:$0xff] (%p2223_p4), %v1248_v28  }
 0x198   : > { %2043 = vst.msk [vmem:[%s2408_s17 + $0xfc] sm:$0xf] %vm392_vm1, %v1012_v40 }
 0x199   : > { %v1116_v8 = vpack.c.bf16 %v1099_v7, %v1099_v7  ;;  %1169 = vst [vmem:[%s2878_s11 + $0x8] sm:$0xff] (%p2223_p4), %v1168_v48   ;;  %v1256_v31 = vld [vmem:[%s2408_s17 + $0xb8] sm:$0xff] (%p2223_p4)  }
 0x19a   : > { %1253 = vst [vmem:[%s2878_s11 + $0x1b0] sm:$0xff] (%p2223_p4), %v1252_v29  }
 0x19b   : > { %2080 = vst.msk [vmem:[%s2412_s12 + $0xfc] sm:$0xf] %vm392_vm1, %v1116_v8 }
 0x19c   : > { %1257 = vst [vmem:[%s2878_s11 + $0x1b8] sm:$0xff] %v1256_v31  }
 0x19d   : > { %1261 = vst [vmem:[%s2878_s11 + $0x240] sm:$0xff] %v1260_v32  }
 0x19e   : > { %1265 = vst [vmem:[%s2878_s11 + $0x248] sm:$0xff] %v1264_v34  }
 0x19f   : > { %1269 = vst [vmem:[%s2878_s11 + $0x250] sm:$0xff] %v1268_v35   ;;  %v1288_v43 = vld [vmem:[%s2408_s17 + $0xf8] sm:$0xff]  }
 0x1a0   : > { %1273 = vst [vmem:[%s2878_s11 + $0x258] sm:$0xff] %v1272_v30  }
 0x1a1   : > { %1277 = vst [vmem:[%s2878_s11 + $0x260] sm:$0xff] %v1276_v37  }
 0x1a2   : > { %1281 = vst [vmem:[%s2878_s11 + $0x268] sm:$0xff] %v1280_v38  }
 0x1a3   : > { %1285 = vst [vmem:[%s2878_s11 + $0x270] sm:$0xff] %v1284_v42  }
 0x1a4   : > { %1289 = vst [vmem:[%s2878_s11 + $0x278] sm:$0xff] %v1288_v43  }
 0x1a5 PF: > { %1443 = sbr.rel (!%p2223_p4) target bundleno = 455 (0x1c7), region = 85  ;;  %s2106_s13 = sshll.u32 (%p2223_p4), %s2211_s24, 6  ;;  %v1463_v44 = vld [vmem:[%s2412_s12] sm:$0xff] (%p2223_p4)   ;;  %v1467_v45 = vld [vmem:[%s2412_s12 + $0x8] sm:$0xff] (%p2223_p4)   ;;  %v1471_v46 = vld [vmem:[%s2412_s12 + $0x10] sm:$0xff] (%p2223_p4)  }
 0x1a6   : > { %s2950_s15 = scalar_lea.vmem (%p2223_p4), %s3030_s6, %s2106_s13  ;;  %v1475_v47 = vld [vmem:[%s2412_s12 + $0x18] sm:$0xff] (%p2223_p4)   ;;  %v1479_v20 = vld [vmem:[%s2412_s12 + $0x20] sm:$0xff] (%p2223_p4)   ;;  %v1483_v50 = vld [vmem:[%s2412_s12 + $0x28] sm:$0xff] (%p2223_p4)  }
 0x1a7   : > { %1464 = vst [vmem:[%s2950_s15] sm:$0xff] (%p2223_p4), %v1463_v44   ;;  %v1487_v51 = vld [vmem:[%s2412_s12 + $0x30] sm:$0xff] (%p2223_p4)   ;;  %v1491_v52 = vld [vmem:[%s2412_s12 + $0x38] sm:$0xff] (%p2223_p4)   ;;  %v1495_v39 = vld [vmem:[%s2412_s12 + $0x40] sm:$0xff] (%p2223_p4)  }
 0x1a8   : > { %1468 = vst [vmem:[%s2950_s15 + $0x8] sm:$0xff] (%p2223_p4), %v1467_v45   ;;  %v1499_v53 = vld [vmem:[%s2412_s12 + $0x48] sm:$0xff] (%p2223_p4)   ;;  %v1503_v54 = vld [vmem:[%s2412_s12 + $0x50] sm:$0xff] (%p2223_p4)   ;;  %v1507_v55 = vld [vmem:[%s2412_s12 + $0x58] sm:$0xff] (%p2223_p4)  }
 0x1a9   : > { %1472 = vst [vmem:[%s2950_s15 + $0x10] sm:$0xff] (%p2223_p4), %v1471_v46   ;;  %v1511_v56 = vld [vmem:[%s2412_s12 + $0x60] sm:$0xff] (%p2223_p4)   ;;  %v1515_v57 = vld [vmem:[%s2412_s12 + $0x68] sm:$0xff] (%p2223_p4)   ;;  %v1519_v41 = vld [vmem:[%s2412_s12 + $0x70] sm:$0xff] (%p2223_p4)  }
 0x1aa   : > { %1476 = vst [vmem:[%s2950_s15 + $0x18] sm:$0xff] %v1475_v47   ;;  %v1523_v59 = vld [vmem:[%s2412_s12 + $0x78] sm:$0xff]   ;;  %v1527_v60 = vld [vmem:[%s2412_s12 + $0x80] sm:$0xff]   ;;  %v1531_v61 = vld [vmem:[%s2412_s12 + $0x88] sm:$0xff]  }
 0x1ab   : > { %1480 = vst [vmem:[%s2950_s15 + $0x20] sm:$0xff] %v1479_v20   ;;  %v1535_v62 = vld [vmem:[%s2412_s12 + $0x90] sm:$0xff]   ;;  %v1539_v63 = vld [vmem:[%s2412_s12 + $0x98] sm:$0xff]   ;;  %v1543_v33 = vld [vmem:[%s2412_s12 + $0xa0] sm:$0xff]  }
 0x1ac   : > { %1484 = vst [vmem:[%s2950_s15 + $0x28] sm:$0xff] %v1483_v50   ;;  %v1547_v0 = vld [vmem:[%s2412_s12 + $0xa8] sm:$0xff]   ;;  %v1551_v1 = vld [vmem:[%s2412_s12 + $0xb0] sm:$0xff]   ;;  %v1555_v2 = vld [vmem:[%s2412_s12 + $0xb8] sm:$0xff]  }
 0x1ad   : > { %1488 = vst [vmem:[%s2950_s15 + $0x30] sm:$0xff] %v1487_v51   ;;  %v1559_v3 = vld [vmem:[%s2412_s12 + $0xc0] sm:$0xff]   ;;  %v1563_v4 = vld [vmem:[%s2412_s12 + $0xc8] sm:$0xff]   ;;  %v1567_v49 = vld [vmem:[%s2412_s12 + $0xd0] sm:$0xff]  }
 0x1ae   : > { %1492 = vst [vmem:[%s2950_s15 + $0x38] sm:$0xff] %v1491_v52   ;;  %v1571_v6 = vld [vmem:[%s2412_s12 + $0xd8] sm:$0xff]   ;;  %v1575_v58 = vld [vmem:[%s2412_s12 + $0xe0] sm:$0xff]   ;;  %v1579_v7 = vld [vmem:[%s2412_s12 + $0xe8] sm:$0xff]  }
 0x1af   : > { %1496 = vst [vmem:[%s2950_s15 + $0xc0] sm:$0xff] %v1495_v39   ;;  %v1583_v40 = vld [vmem:[%s2412_s12 + $0xf0] sm:$0xff]   ;;  %v1587_v8 = vld [vmem:[%s2412_s12 + $0xf8] sm:$0xff]  }
 0x1b0   : > { %1500 = vst [vmem:[%s2950_s15 + $0xc8] sm:$0xff] %v1499_v53  }
 0x1b1   : > { %1504 = vst [vmem:[%s2950_s15 + $0xd0] sm:$0xff] %v1503_v54  }
 0x1b2   : > { %1508 = vst [vmem:[%s2950_s15 + $0xd8] sm:$0xff] %v1507_v55  }
 0x1b3   : > { %1512 = vst [vmem:[%s2950_s15 + $0xe0] sm:$0xff] %v1511_v56  }
 0x1b4   : > { %1516 = vst [vmem:[%s2950_s15 + $0xe8] sm:$0xff] %v1515_v57  }
 0x1b5   : > { %1520 = vst [vmem:[%s2950_s15 + $0xf0] sm:$0xff] %v1519_v41  }
 0x1b6   : > { %1524 = vst [vmem:[%s2950_s15 + $0xf8] sm:$0xff] %v1523_v59  }
 0x1b7   : > { %1528 = vst [vmem:[%s2950_s15 + $0x180] sm:$0xff] %v1527_v60  }
 0x1b8   : > { %1532 = vst [vmem:[%s2950_s15 + $0x188] sm:$0xff] %v1531_v61  }
 0x1b9   : > { %1536 = vst [vmem:[%s2950_s15 + $0x190] sm:$0xff] %v1535_v62  }
 0x1ba   : > { %1540 = vst [vmem:[%s2950_s15 + $0x198] sm:$0xff] %v1539_v63  }
 0x1bb   : > { %1544 = vst [vmem:[%s2950_s15 + $0x1a0] sm:$0xff] %v1543_v33  }
 0x1bc   : > { %1548 = vst [vmem:[%s2950_s15 + $0x1a8] sm:$0xff] %v1547_v0  }
 0x1bd   : > { %1552 = vst [vmem:[%s2950_s15 + $0x1b0] sm:$0xff] %v1551_v1  }
 0x1be   : > { %1556 = vst [vmem:[%s2950_s15 + $0x1b8] sm:$0xff] %v1555_v2  }
 0x1bf   : > { %1560 = vst [vmem:[%s2950_s15 + $0x240] sm:$0xff] %v1559_v3  }
 0x1c0   : > { %1564 = vst [vmem:[%s2950_s15 + $0x248] sm:$0xff] %v1563_v4  }
 0x1c1   : > { %1568 = vst [vmem:[%s2950_s15 + $0x250] sm:$0xff] %v1567_v49  }
 0x1c2   : > { %1572 = vst [vmem:[%s2950_s15 + $0x258] sm:$0xff] %v1571_v6  }
 0x1c3   : > { %1576 = vst [vmem:[%s2950_s15 + $0x260] sm:$0xff] %v1575_v58  }
 0x1c4   : > { %1580 = vst [vmem:[%s2950_s15 + $0x268] sm:$0xff] %v1579_v7  }
 0x1c5   : > { %1584 = vst [vmem:[%s2950_s15 + $0x270] sm:$0xff] %v1583_v40  }
 0x1c6   : > { %1588 = vst [vmem:[%s2950_s15 + $0x278] sm:$0xff] %v1587_v8  }
 0x1c7 PF: > { %p14_p8 = scmp.ge.s32.totalorder %s2213_s25, 5   ;;  %s3032_s21 = smov %s2157_s22 }
 0x1c8   : > { %s3033_s22 = smov %s2221_s28  ;;  %s3034_s23 = smov %s2213_s25 }
 0x1c9   :  { %16 = sbr.rel (!%p14_p8) target bundleno = 2 (0x2), region = 182 }

</bundles_post_ra>
